<compile_context>
chip_gen: v5e
topology: v5e:2x2
jax: 0.10.0
libtpu: 0.0.40
codegen_flags: <defaults>
</compile_context>

<pallas_src>
import functools

import jax
import jax.numpy as jnp
from jax import lax
from jax.experimental import pallas as pl
from jax.experimental.pallas import tpu as pltpu

_BN_EPS = 1e-5
_LANE = 128


def _round_up(x, m):
    return (x + m - 1) // m * m


def _vmem_limit_bytes():
    # Generation-aware: ~70% of per-core VMEM (v5e/v6e: 128 MiB, v7x: 64 MiB).
    try:
        cap = pltpu.get_tpu_info().vmem_capacity_bytes
    except Exception:
        cap = 64 * 1024 * 1024
    return int(min(cap * 7 // 10, 100 * 1024 * 1024))


_VMEM_LIMIT = None


def _cparams(n_axes):
    global _VMEM_LIMIT
    if _VMEM_LIMIT is None:
        _VMEM_LIMIT = _vmem_limit_bytes()
    sem = ("parallel",) + ("arbitrary",) * (n_axes - 1)
    return pltpu.CompilerParams(dimension_semantics=sem,
                                vmem_limit_bytes=_VMEM_LIMIT)


def _choose_tile_m(m, max_tm=512):
    """Largest multiple-of-8 divisor of m (<= max_tm); avoids XLA pad/slice passes."""
    start = min(max_tm, m)
    start -= start % 8
    for tm in range(start, 7, -8):
        if m % tm == 0:
            return tm
    return max(8, min(max_tm, _round_up(m, 8)))


def _choose_tile_h(h2, w2p, cap_rows=512):
    """Largest divisor of h2 keeping the per-tile matmul M dim bounded."""
    best = 1
    for th in range(1, h2 + 1):
        if h2 % th == 0 and th * w2p <= cap_rows:
            best = th
    return best


# ----------------------------- Pallas kernels ------------------------------ #

def _mm_bn_kernel(x_ref, w_ref, s_ref, b_ref, o_ref, *, relu):
    # (TM, K) @ (K, C) on the MXU (bf16 in, f32 acc) + fused BN affine (+ReLU).
    y = jnp.dot(x_ref[...], w_ref[...], preferred_element_type=jnp.float32)
    y = y * s_ref[...] + b_ref[...]
    if relu:
        y = jnp.maximum(y, 0.0)
    o_ref[...] = y.astype(o_ref.dtype)


def _mm_bn_ds_res_relu_kernel(x_ref, w_ref, s_ref, b_ref,
                              id_ref, wd_ref, sd_ref, bd_ref, o_ref):
    # conv3 + bn3, downsample conv + bn, residual add, ReLU — fully fused.
    y = jnp.dot(x_ref[...], w_ref[...], preferred_element_type=jnp.float32)
    y = y * s_ref[...] + b_ref[...]
    r = jnp.dot(id_ref[...], wd_ref[...], preferred_element_type=jnp.float32)
    r = r * sd_ref[...] + bd_ref[...]
    o_ref[...] = jnp.maximum(y + r, 0.0).astype(o_ref.dtype)


def _mm_bn_res_relu_kernel(x_ref, w_ref, s_ref, b_ref, id_ref, o_ref):
    # conv3 + bn3 + plain identity residual + ReLU (no downsample path).
    y = jnp.dot(x_ref[...], w_ref[...], preferred_element_type=jnp.float32)
    y = y * s_ref[...] + b_ref[...] + id_ref[...].astype(jnp.float32)
    o_ref[...] = jnp.maximum(y, 0.0).astype(o_ref.dtype)


def _conv3x3_kernel(x_ref, w_ref, s_ref, b_ref, o_ref, *, taps, th, w2, w2p, c):
    # x_ref: (PH, Wph, C) phase-split padded activation (bf16), resident per image.
    # w_ref: (9*C, C) weights, tap t occupies rows [t*C, (t+1)*C).
    # Deep-K: build a (th*w2p, 9*C) im2col slab in VMEM (never in HBM) and do a
    # single matmul (uses the full 256-deep contraction on v6e/v7x), then fuse
    # BN affine + ReLU. w2p is a multiple of 8 so reshapes are layout-preserving.
    row0 = pl.program_id(1) * th
    wins = [x_ref[pl.ds(r0 + row0, th), pl.ds(c0, w2p), :] for (r0, c0) in taps]
    slab = jnp.concatenate(wins, axis=-1).reshape(th * w2p, 9 * c)
    y = jnp.dot(slab, w_ref[...], preferred_element_type=jnp.float32)
    y = jnp.maximum(y * s_ref[...] + b_ref[...], 0.0)
    y = y.reshape(th, w2p, c)[:, :w2, :]
    o_ref[...] = y.astype(o_ref.dtype)


# ------------------------------ kernel wrappers ----------------------------- #

def conv1x1_bn(x2d, w, scale, bias, *, relu, out_dtype, block_m=512):
    """Row-tiled 1x1 conv as matmul + fused BN (+ReLU)."""
    M, K = x2d.shape
    C = w.shape[1]
    tm = _choose_tile_m(M, block_m)
    Mp = _round_up(M, tm)
    if Mp != M:
        x2d = jnp.pad(x2d, ((0, Mp - M), (0, 0)))
    out = pl.pallas_call(
        functools.partial(_mm_bn_kernel, relu=relu),
        out_shape=jax.ShapeDtypeStruct((Mp, C), out_dtype),
        grid=(Mp // tm,),
        in_specs=[
            pl.BlockSpec((tm, K), lambda i: (i, 0)),
            pl.BlockSpec((K, C), lambda i: (0, 0)),
            pl.BlockSpec((1, C), lambda i: (0, 0)),
            pl.BlockSpec((1, C), lambda i: (0, 0)),
        ],
        out_specs=pl.BlockSpec((tm, C), lambda i: (i, 0)),
        compiler_params=_cparams(1),
    )(x2d, w, scale, bias)
    return out[:M] if Mp != M else out


def conv1x1_bn_res(x2d, w, scale, bias, id2d, wd=None, sd=None, bd=None,
                   *, out_dtype=jnp.bfloat16, block_m=512):
    """conv3 + bn3 + (optional downsample conv+bn) + residual add + ReLU."""
    M, K = x2d.shape
    C = w.shape[1]
    tm = _choose_tile_m(M, block_m)
    Mp = _round_up(M, tm)
    if Mp != M:
        x2d = jnp.pad(x2d, ((0, Mp - M), (0, 0)))
        id2d = jnp.pad(id2d, ((0, Mp - M), (0, 0)))
    row = lambda: pl.BlockSpec((1, C), lambda i: (0, 0))
    if wd is not None:
        Kd = id2d.shape[1]
        out = pl.pallas_call(
            _mm_bn_ds_res_relu_kernel,
            out_shape=jax.ShapeDtypeStruct((Mp, C), out_dtype),
            grid=(Mp // tm,),
            in_specs=[
                pl.BlockSpec((tm, K), lambda i: (i, 0)),
                pl.BlockSpec((K, C), lambda i: (0, 0)),
                row(), row(),
                pl.BlockSpec((tm, Kd), lambda i: (i, 0)),
                pl.BlockSpec((Kd, C), lambda i: (0, 0)),
                row(), row(),
            ],
            out_specs=pl.BlockSpec((tm, C), lambda i: (i, 0)),
            compiler_params=_cparams(1),
        )(x2d, w, scale, bias, id2d, wd, sd, bd)
    else:
        out = pl.pallas_call(
            _mm_bn_res_relu_kernel,
            out_shape=jax.ShapeDtypeStruct((Mp, C), out_dtype),
            grid=(Mp // tm,),
            in_specs=[
                pl.BlockSpec((tm, K), lambda i: (i, 0)),
                pl.BlockSpec((K, C), lambda i: (0, 0)),
                row(), row(),
                pl.BlockSpec((tm, C), lambda i: (i, 0)),
            ],
            out_specs=pl.BlockSpec((tm, C), lambda i: (i, 0)),
            compiler_params=_cparams(1),
        )(x2d, w, scale, bias, id2d)
    return out[:M] if Mp != M else out


def conv3x3_bn_relu(x_nhwc, w2_flat, scale, bias, *, stride,
                    out_dtype=jnp.bfloat16):
    """3x3 conv (pad=1, stride) + BN + ReLU via spatially tiled deep-K matmuls."""
    N, H, W, C = x_nhwc.shape
    s = stride
    H2 = (H - 1) // s + 1
    W2 = (W - 1) // s + 1
    w2p = _round_up(W2, 8)                    # keep in-kernel reshapes layout-preserving
    edge = 2 // s                             # max per-phase tap offset (kh//s, kw//s)
    Hpp = max(_round_up(H + 2, s), s * (H2 + edge))
    Wpp = max(_round_up(W + 2, s), s * (w2p + edge))
    Hph, Wph = Hpp // s, Wpp // s
    xp = jnp.pad(x_nhwc, ((0, 0), (1, Hpp - H - 1), (1, Wpp - W - 1), (0, 0)))
    if s == 1:
        xph = xp                              # no phase-split pass needed
    else:
        # TODO(synk): for stride>1 this is still one XLA space-to-depth pass; it
        # could move into the kernel via strided pl.ds reads.
        phases = [xp[:, ph::s, pw::s, :] for ph in range(s) for pw in range(s)]
        xph = jnp.stack(phases, axis=1).reshape(N, s * s * Hph, Wph, C)
    # static (row, col) start of each of the 9 taps inside the phase tensor
    taps = tuple((((kh % s) * s + (kw % s)) * Hph + kh // s, kw // s)
                 for kh in range(3) for kw in range(3))
    th = _choose_tile_h(H2, w2p)              # spatial row tile (bounded matmul M)
    sph = s * s * Hph
    kernel = functools.partial(_conv3x3_kernel, taps=taps, th=th,
                               w2=W2, w2p=w2p, c=C)
    return pl.pallas_call(
        kernel,
        out_shape=jax.ShapeDtypeStruct((N, H2, W2, C), out_dtype),
        grid=(N, H2 // th),
        in_specs=[
            pl.BlockSpec((None, sph, Wph, C), lambda n, i: (n, 0, 0, 0)),
            pl.BlockSpec((9 * C, C), lambda n, i: (0, 0)),
            pl.BlockSpec((1, C), lambda n, i: (0, 0)),
            pl.BlockSpec((1, C), lambda n, i: (0, 0)),
        ],
        out_specs=pl.BlockSpec((None, th, W2, C), lambda n, i: (n, i, 0, 0)),
        compiler_params=_cparams(2),
    )(xph, w2_flat, scale, bias)


# ------------------------------- parameters -------------------------------- #

def init_bottleneck_params(key, in_channel, mid_channel):
    out_channel = mid_channel * 4
    ks = jax.random.split(key, 12)

    def conv_w(k, kh, kw, cin, cout):
        return 0.1 * jax.random.normal(k, (kh, kw, cin, cout), dtype=jnp.float32)

    def bn(k, c):
        k1, k2, k3, k4 = jax.random.split(k, 4)
        return dict(
            gamma=jax.random.uniform(k1, (c,), minval=0.5, maxval=1.5),
            beta=0.1 * jax.random.normal(k2, (c,)),
            mean=0.1 * jax.random.normal(k3, (c,)),
            var=jax.random.uniform(k4, (c,), minval=0.5, maxval=1.5),
        )

    return dict(
        w1=conv_w(ks[0], 1, 1, in_channel, mid_channel), bn1=bn(ks[1], mid_channel),
        w2=conv_w(ks[2], 3, 3, mid_channel, mid_channel), bn2=bn(ks[3], mid_channel),
        w3=conv_w(ks[4], 1, 1, mid_channel, out_channel), bn3=bn(ks[5], out_channel),
        wd=conv_w(ks[6], 1, 1, in_channel, out_channel),
        wd_bias=0.1 * jax.random.normal(ks[7], (out_channel,)),   # nn.Conv2d default bias
        bnd=bn(ks[8], out_channel),
    )


def _bn_fold(d):
    scale = d["gamma"] / jnp.sqrt(d["var"] + _BN_EPS)
    bias = d["beta"] - d["mean"] * scale
    return scale, bias


def prepare_params(p, in_channel, mid_channel):
    """Fold BN, pad channels to 128 lanes, cast weights to bf16."""
    # TODO(synk): padding the contraction dim to 128 wastes MXU work when
    # mid_channel < 128; only the output/lane dim strictly needs 128-density.
    out_channel = mid_channel * 4
    cin_p = _round_up(in_channel, _LANE)
    cmid_p = _round_up(mid_channel, _LANE)
    cout_p = _round_up(out_channel, _LANE)

    def pad_w(w, ci_p, co_p):
        kh, kw, ci, co = w.shape
        w = jnp.pad(w, ((0, 0), (0, 0), (0, ci_p - ci), (0, co_p - co)))
        return w.reshape(kh * kw * ci_p, co_p).astype(jnp.bfloat16)

    def pad_row(v, c_p):
        return jnp.pad(v, (0, c_p - v.shape[0])).reshape(1, c_p).astype(jnp.float32)

    s1, b1 = _bn_fold(p["bn1"])
    s2, b2 = _bn_fold(p["bn2"])
    s3, b3 = _bn_fold(p["bn3"])
    sd, bd = _bn_fold(p["bnd"])
    bd = bd + sd * p["wd_bias"]          # fold downsample conv bias into BN bias

    return dict(
        w1=pad_w(p["w1"], cin_p, cmid_p), s1=pad_row(s1, cmid_p), b1=pad_row(b1, cmid_p),
        w2=pad_w(p["w2"], cmid_p, cmid_p), s2=pad_row(s2, cmid_p), b2=pad_row(b2, cmid_p),
        w3=pad_w(p["w3"], cmid_p, cout_p), s3=pad_row(s3, cout_p), b3=pad_row(b3, cout_p),
        wd=pad_w(p["wd"], cin_p, cout_p), sd=pad_row(sd, cout_p), bd=pad_row(bd, cout_p),
    )


# ------------------------------ forward pass ------------------------------- #

def bottleneck_forward(x_nchw, pp, in_channel, mid_channel, stride=1):
    out_channel = mid_channel * 4
    has_downsample = (in_channel != out_channel) or (stride != 1)
    cin_p = _round_up(in_channel, _LANE)
    cmid_p = _round_up(mid_channel, _LANE)
    cout_p = _round_up(out_channel, _LANE)

    # TODO(synk): if blocks are chained, keep the whole network in padded-NHWC
    # and drop these entry/exit transposes + channel pad/slice passes.
    x = jnp.transpose(x_nchw, (0, 2, 3, 1))                      # NCHW -> NHWC
    N, H, W, _ = x.shape
    x = jnp.pad(x, ((0, 0), (0, 0), (0, 0), (0, cin_p - in_channel))).astype(jnp.bfloat16)

    # conv1 (1x1) + bn1 + relu
    # TODO(synk): fusing conv1 into the 3x3 kernel (per-tile halo compute) would
    # remove out1's HBM round trip; kept as a separate kernel for robustness.
    out1 = conv1x1_bn(x.reshape(N * H * W, cin_p), pp["w1"], pp["s1"], pp["b1"],
                      relu=True, out_dtype=jnp.bfloat16)
    out1 = out1.reshape(N, H, W, cmid_p)

    # conv2 (3x3, stride, pad=1) + bn2 + relu — spatially tiled, deep-K matmul
    out2 = conv3x3_bn_relu(out1, pp["w2"], pp["s2"], pp["b2"], stride=stride)
    _, H2, W2, _ = out2.shape
    out2_2d = out2.reshape(N * H2 * W2, cmid_p)

    # conv3 (1x1) + bn3 + identity path + add + relu, fused in one kernel
    if has_downsample:
        # TODO(synk): the strided identity gather could move into the fused
        # kernel (index_map / strided pl.ds) to save one XLA copy.
        id2d = x[:, ::stride, ::stride, :].reshape(N * H2 * W2, cin_p)
        out3 = conv1x1_bn_res(out2_2d, pp["w3"], pp["s3"], pp["b3"],
                              id2d, pp["wd"], pp["sd"], pp["bd"])
    else:
        id2d = x.reshape(N * H * W, cin_p)                       # cin_p == cout_p
        out3 = conv1x1_bn_res(out2_2d, pp["w3"], pp["s3"], pp["b3"], id2d)

    out = out3.reshape(N, H2, W2, cout_p)[..., :out_channel]
    return jnp.transpose(out, (0, 3, 1, 2)).astype(jnp.float32)  # NHWC -> NCHW


# ------------------------- pure-JAX f32 reference --------------------------- #

def reference_forward(x_nchw, p, in_channel, mid_channel, stride=1):
    out_channel = mid_channel * 4
    has_downsample = (in_channel != out_channel) or (stride != 1)
    x = jnp.transpose(x_nchw, (0, 2, 3, 1))
    dn = ("NHWC", "HWIO", "NHWC")

    def conv(v, w, s=1, pad=0):
        return lax.conv_general_dilated(v, w, (s, s), [(pad, pad), (pad, pad)],
                                        dimension_numbers=dn)

    def bn(v, d):
        return (v - d["mean"]) / jnp.sqrt(d["var"] + _BN_EPS) * d["gamma"] + d["beta"]

    out = jax.nn.relu(bn(conv(x, p["w1"]), p["bn1"]))
    out = jax.nn.relu(bn(conv(out, p["w2"], s=stride, pad=1), p["bn2"]))
    out = bn(conv(out, p["w3"]), p["bn3"])
    if has_downsample:
        identity = bn(conv(x, p["wd"], s=stride) + p["wd_bias"], p["bnd"])
    else:
        identity = x
    out = jax.nn.relu(out + identity)
    return jnp.transpose(out, (0, 3, 1, 2))


# ---------------------------------- main ----------------------------------- #

if __name__ == "__main__":
    key = jax.random.PRNGKey(0)
    k_x, k_p = jax.random.split(key)

    in_channel, mid_channel, stride = 8, 4, 2
    N, H, W = 2, 16, 16

    x = jax.random.normal(k_x, (N, in_channel, H, W), dtype=jnp.float32)
    raw = init_bottleneck_params(k_p, in_channel, mid_channel)
    pp = prepare_params(raw, in_channel, mid_channel)

    fwd = jax.jit(functools.partial(bottleneck_forward,
                                    in_channel=in_channel,
                                    mid_channel=mid_channel,
                                    stride=stride))
    y = jax.block_until_ready(fwd(x, pp))

    H2 = (H - 1) // stride + 1
    expected = (N, mid_channel * 4, H2, H2)
    assert y.shape == expected, (y.shape, expected)
    assert bool(jnp.all(y >= 0.0))                         # final ReLU

    y_ref = reference_forward(x, raw, in_channel, mid_channel, stride=stride)
    max_err = float(jnp.max(jnp.abs(y.astype(jnp.float32) - y_ref)))
    assert max_err < 0.1, max_err                          # bf16 matmul tolerance

    print("KERNEL_OK")
</pallas_src>

<mosaic_0001>
module attributes {stable_mosaic.version = 11 : i64} {
  func.func @_mm_bn_kernel(%arg0: i32, %arg1: memref<512x128xbf16, #tpu.memory_space<vmem>>, %arg2: memref<128x128xbf16, #tpu.memory_space<vmem>>, %arg3: memref<1x128xf32, #tpu.memory_space<vmem>>, %arg4: memref<1x128xf32, #tpu.memory_space<vmem>>, %arg5: memref<512x128xbf16, #tpu.memory_space<vmem>>) attributes {dimension_semantics = [#tpu.dimension_semantics<parallel>], iteration_bounds = array<i64: 1>, scalar_prefetch = 0 : i64, scratch_operands = 0 : i64, tpu.core_type = #tpu.core_type<tc>, window_params = [{transform_indices = @transform_0, window_bounds = array<i64: 512, 128>}, {pipeline_mode = #tpu.pipeline_mode<synchronous>, transform_indices = @transform_1, window_bounds = array<i64: 128, 128>}, {pipeline_mode = #tpu.pipeline_mode<synchronous>, transform_indices = @transform_2, window_bounds = array<i64: 1, 128>}, {pipeline_mode = #tpu.pipeline_mode<synchronous>, transform_indices = @transform_3, window_bounds = array<i64: 1, 128>}, {transform_indices = @transform_4, window_bounds = array<i64: 512, 128>}]} {
    %c0 = arith.constant 0 : index
    %c0_0 = arith.constant 0 : index
    %0 = vector.load %arg1[%c0, %c0_0] : memref<512x128xbf16, #tpu.memory_space<vmem>>, vector<512x128xbf16>
    %c0_1 = arith.constant 0 : index
    %c0_2 = arith.constant 0 : index
    %1 = vector.load %arg2[%c0_1, %c0_2] : memref<128x128xbf16, #tpu.memory_space<vmem>>, vector<128x128xbf16>
    %cst = arith.constant dense<0.000000e+00> : vector<512x128xf32>
    %2 = tpu.matmul %0, %1, %cst {dimension_numbers = #tpu.dot_dimension_numbers<[1], [0], [0], [1], [0, 0, 1, 1], [], []>} : vector<512x128xbf16>, vector<128x128xbf16>, vector<512x128xf32> -> vector<512x128xf32>
    %c0_3 = arith.constant 0 : index
    %c0_4 = arith.constant 0 : index
    %3 = vector.load %arg3[%c0_3, %c0_4] : memref<1x128xf32, #tpu.memory_space<vmem>>, vector<1x128xf32>
    %4 = vector.broadcast %3 : vector<1x128xf32> to vector<512x128xf32>
    %5 = arith.mulf %2, %4 : vector<512x128xf32>
    %c0_5 = arith.constant 0 : index
    %c0_6 = arith.constant 0 : index
    %6 = vector.load %arg4[%c0_5, %c0_6] : memref<1x128xf32, #tpu.memory_space<vmem>>, vector<1x128xf32>
    %7 = vector.broadcast %6 : vector<1x128xf32> to vector<512x128xf32>
    %8 = arith.addf %5, %7 : vector<512x128xf32>
    %cst_7 = arith.constant 0.000000e+00 : f32
    %9 = vector.broadcast %cst_7 : f32 to vector<512x128xf32>
    %10 = arith.maximumf %8, %9 : vector<512x128xf32>
    %11 = arith.truncf %10 : vector<512x128xf32> to vector<512x128xbf16>
    %c0_8 = arith.constant 0 : index
    %c0_9 = arith.constant 0 : index
    %12 = vector.load %arg5[%c0_8, %c0_9] : memref<512x128xbf16, #tpu.memory_space<vmem>>, vector<512x128xbf16>
    tpu.vector_store %arg5[%c0_8, %c0_9], %11 {strides = array<i32>} : memref<512x128xbf16, #tpu.memory_space<vmem>>, vector<512x128xbf16>,
    return
  }
  func.func @transform_0(%arg0: i32) -> (i32, i32) {
    %c0_i32 = arith.constant 0 : i32
    %c0_i32_0 = arith.constant 0 : i32
    return %arg0, %c0_i32 : i32, i32
  }
  func.func @transform_1(%arg0: i32) -> (i32, i32) {
    %c0_i32 = arith.constant 0 : i32
    %c0_i32_0 = arith.constant 0 : i32
    %c0_i32_1 = arith.constant 0 : i32
    return %c0_i32, %c0_i32_0 : i32, i32
  }
  func.func @transform_2(%arg0: i32) -> (i32, i32) {
    %c0_i32 = arith.constant 0 : i32
    %c0_i32_0 = arith.constant 0 : i32
    %c0_i32_1 = arith.constant 0 : i32
    return %c0_i32, %c0_i32_0 : i32, i32
  }
  func.func @transform_3(%arg0: i32) -> (i32, i32) {
    %c0_i32 = arith.constant 0 : i32
    %c0_i32_0 = arith.constant 0 : i32
    %c0_i32_1 = arith.constant 0 : i32
    return %c0_i32, %c0_i32_0 : i32, i32
  }
  func.func @transform_4(%arg0: i32) -> (i32, i32) {
    %c0_i32 = arith.constant 0 : i32
    %c0_i32_0 = arith.constant 0 : i32
    return %arg0, %c0_i32 : i32, i32
  }
}

module attributes {stable_mosaic.version = 11 : i64} {
  func.func @_conv3x3_kernel(%arg0: i32, %arg1: i32, %arg2: memref<1x36x9x128xbf16, #tpu.memory_space<vmem>>, %arg3: memref<1152x128xbf16, #tpu.memory_space<vmem>>, %arg4: memref<1x128xf32, #tpu.memory_space<vmem>>, %arg5: memref<1x128xf32, #tpu.memory_space<vmem>>, %arg6: memref<1x8x8x128xbf16, #tpu.memory_space<vmem>>) attributes {dimension_semantics = [#tpu.dimension_semantics<parallel>, #tpu.dimension_semantics<arbitrary>], iteration_bounds = array<i64: 2, 1>, scalar_prefetch = 0 : i64, scratch_operands = 0 : i64, tpu.core_type = #tpu.core_type<tc>, window_params = [{transform_indices = @transform_0, window_bounds = array<i64: 1, 36, 9, 128>}, {pipeline_mode = #tpu.pipeline_mode<synchronous>, transform_indices = @transform_1, window_bounds = array<i64: 1152, 128>}, {pipeline_mode = #tpu.pipeline_mode<synchronous>, transform_indices = @transform_2, window_bounds = array<i64: 1, 128>}, {pipeline_mode = #tpu.pipeline_mode<synchronous>, transform_indices = @transform_3, window_bounds = array<i64: 1, 128>}, {transform_indices = @transform_4, window_bounds = array<i64: 1, 8, 8, 128>}]} {
    %c8_i32 = arith.constant 8 : i32
    %0 = arith.muli %arg1, %c8_i32 : i32
    %c0_i32 = arith.constant 0 : i32
    %1 = arith.addi %c0_i32, %0 : i32
    %c0 = arith.constant 0 : index
    %2 = arith.index_cast %1 : i32 to index
    %c0_0 = arith.constant 0 : index
    %c0_1 = arith.constant 0 : index
    %3 = vector.load %arg2[%c0, %2, %c0_0, %c0_1] : memref<1x36x9x128xbf16, #tpu.memory_space<vmem>>, vector<1x8x8x128xbf16>
    %4 = vector.shape_cast %3 : vector<1x8x8x128xbf16> to vector<8x8x128xbf16>
    %c9_i32 = arith.constant 9 : i32
    %5 = arith.addi %c9_i32, %0 : i32
    %c0_2 = arith.constant 0 : index
    %6 = arith.index_cast %5 : i32 to index
    %c0_3 = arith.constant 0 : index
    %c0_4 = arith.constant 0 : index
    %7 = vector.load %arg2[%c0_2, %6, %c0_3, %c0_4] : memref<1x36x9x128xbf16, #tpu.memory_space<vmem>>, vector<1x8x8x128xbf16>
    %8 = vector.shape_cast %7 : vector<1x8x8x128xbf16> to vector<8x8x128xbf16>
    %c0_i32_5 = arith.constant 0 : i32
    %9 = arith.addi %c0_i32_5, %0 : i32
    %c0_6 = arith.constant 0 : index
    %10 = arith.index_cast %9 : i32 to index
    %c1 = arith.constant 1 : index
    %c0_7 = arith.constant 0 : index
    %11 = vector.load %arg2[%c0_6, %10, %c1, %c0_7] : memref<1x36x9x128xbf16, #tpu.memory_space<vmem>>, vector<1x8x8x128xbf16>
    %12 = vector.shape_cast %11 : vector<1x8x8x128xbf16> to vector<8x8x128xbf16>
    %c18_i32 = arith.constant 18 : i32
    %13 = arith.addi %c18_i32, %0 : i32
    %c0_8 = arith.constant 0 : index
    %14 = arith.index_cast %13 : i32 to index
    %c0_9 = arith.constant 0 : index
    %c0_10 = arith.constant 0 : index
    %15 = vector.load %arg2[%c0_8, %14, %c0_9, %c0_10] : memref<1x36x9x128xbf16, #tpu.memory_space<vmem>>, vector<1x8x8x128xbf16>
    %16 = vector.shape_cast %15 : vector<1x8x8x128xbf16> to vector<8x8x128xbf16>
    %c27_i32 = arith.constant 27 : i32
    %17 = arith.addi %c27_i32, %0 : i32
    %c0_11 = arith.constant 0 : index
    %18 = arith.index_cast %17 : i32 to index
    %c0_12 = arith.constant 0 : index
    %c0_13 = arith.constant 0 : index
    %19 = vector.load %arg2[%c0_11, %18, %c0_12, %c0_13] : memref<1x36x9x128xbf16, #tpu.memory_space<vmem>>, vector<1x8x8x128xbf16>
    %20 = vector.shape_cast %19 : vector<1x8x8x128xbf16> to vector<8x8x128xbf16>
    %c18_i32_14 = arith.constant 18 : i32
    %21 = arith.addi %c18_i32_14, %0 : i32
    %c0_15 = arith.constant 0 : index
    %22 = arith.index_cast %21 : i32 to index
    %c1_16 = arith.constant 1 : index
    %c0_17 = arith.constant 0 : index
    %23 = vector.load %arg2[%c0_15, %22, %c1_16, %c0_17] : memref<1x36x9x128xbf16, #tpu.memory_space<vmem>>, vector<1x8x8x128xbf16>
    %24 = vector.shape_cast %23 : vector<1x8x8x128xbf16> to vector<8x8x128xbf16>
    %c1_i32 = arith.constant 1 : i32
    %25 = arith.addi %c1_i32, %0 : i32
    %c0_18 = arith.constant 0 : index
    %26 = arith.index_cast %25 : i32 to index
    %c0_19 = arith.constant 0 : index
    %c0_20 = arith.constant 0 : index
    %27 = vector.load %arg2[%c0_18, %26, %c0_19, %c0_20] : memref<1x36x9x128xbf16, #tpu.memory_space<vmem>>, vector<1x8x8x128xbf16>
    %28 = vector.shape_cast %27 : vector<1x8x8x128xbf16> to vector<8x8x128xbf16>
    %c10_i32 = arith.constant 10 : i32
    %29 = arith.addi %c10_i32, %0 : i32
    %c0_21 = arith.constant 0 : index
    %30 = arith.index_cast %29 : i32 to index
    %c0_22 = arith.constant 0 : index
    %c0_23 = arith.constant 0 : index
    %31 = vector.load %arg2[%c0_21, %30, %c0_22, %c0_23] : memref<1x36x9x128xbf16, #tpu.memory_space<vmem>>, vector<1x8x8x128xbf16>
    %32 = vector.shape_cast %31 : vector<1x8x8x128xbf16> to vector<8x8x128xbf16>
    %c1_i32_24 = arith.constant 1 : i32
    %33 = arith.addi %c1_i32_24, %0 : i32
    %c0_25 = arith.constant 0 : index
    %34 = arith.index_cast %33 : i32 to index
    %c1_26 = arith.constant 1 : index
    %c0_27 = arith.constant 0 : index
    %35 = vector.load %arg2[%c0_25, %34, %c1_26, %c0_27] : memref<1x36x9x128xbf16, #tpu.memory_space<vmem>>, vector<1x8x8x128xbf16>
    %36 = vector.shape_cast %35 : vector<1x8x8x128xbf16> to vector<8x8x128xbf16>
    %37 = tpu.concatenate %4, %8, %12, %16, %20, %24, %28, %32, %36 in 2 : vector<8x8x128xbf16>, vector<8x8x128xbf16>, vector<8x8x128xbf16>, vector<8x8x128xbf16>, vector<8x8x128xbf16>, vector<8x8x128xbf16>, vector<8x8x128xbf16>, vector<8x8x128xbf16>, vector<8x8x128xbf16> -> vector<8x8x1152xbf16>
    %38 = vector.shape_cast %37 : vector<8x8x1152xbf16> to vector<64x1152xbf16>
    %c0_28 = arith.constant 0 : index
    %c0_29 = arith.constant 0 : index
    %39 = vector.load %arg3[%c0_28, %c0_29] : memref<1152x128xbf16, #tpu.memory_space<vmem>>, vector<1152x128xbf16>
    %cst = arith.constant dense<0.000000e+00> : vector<64x128xf32>
    %40 = tpu.matmul %38, %39, %cst {dimension_numbers = #tpu.dot_dimension_numbers<[1], [0], [0], [1], [0, 0, 1, 1], [], []>} : vector<64x1152xbf16>, vector<1152x128xbf16>, vector<64x128xf32> -> vector<64x128xf32>
    %c0_30 = arith.constant 0 : index
    %c0_31 = arith.constant 0 : index
    %41 = vector.load %arg4[%c0_30, %c0_31] : memref<1x128xf32, #tpu.memory_space<vmem>>, vector<1x128xf32>
    %42 = vector.broadcast %41 : vector<1x128xf32> to vector<64x128xf32>
    %43 = arith.mulf %40, %42 : vector<64x128xf32>
    %c0_32 = arith.constant 0 : index
    %c0_33 = arith.constant 0 : index
    %44 = vector.load %arg5[%c0_32, %c0_33] : memref<1x128xf32, #tpu.memory_space<vmem>>, vector<1x128xf32>
    %45 = vector.broadcast %44 : vector<1x128xf32> to vector<64x128xf32>
    %46 = arith.addf %43, %45 : vector<64x128xf32>
    %cst_34 = arith.constant 0.000000e+00 : f32
    %47 = vector.broadcast %cst_34 : f32 to vector<64x128xf32>
    %48 = arith.maximumf %46, %47 : vector<64x128xf32>
    %49 = vector.shape_cast %48 : vector<64x128xf32> to vector<8x8x128xf32>
    %50 = arith.truncf %49 : vector<8x8x128xf32> to vector<8x8x128xbf16>
    %c0_35 = arith.constant 0 : index
    %c0_36 = arith.constant 0 : index
    %c0_37 = arith.constant 0 : index
    %c0_38 = arith.constant 0 : index
    %51 = vector.load %arg6[%c0_35, %c0_36, %c0_37, %c0_38] : memref<1x8x8x128xbf16, #tpu.memory_space<vmem>>, vector<1x8x8x128xbf16>
    %52 = vector.shape_cast %51 : vector<1x8x8x128xbf16> to vector<8x8x128xbf16>
    %53 = vector.shape_cast %50 : vector<8x8x128xbf16> to vector<1x8x8x128xbf16>
    tpu.vector_store %arg6[%c0_35, %c0_36, %c0_37, %c0_38], %53 {strides = array<i32>} : memref<1x8x8x128xbf16, #tpu.memory_space<vmem>>, vector<1x8x8x128xbf16>,
    return
  }
  func.func @transform_0(%arg0: i32, %arg1: i32) -> (i32, i32, i32, i32) {
    %c0_i32 = arith.constant 0 : i32
    %c0_i32_0 = arith.constant 0 : i32
    %c0_i32_1 = arith.constant 0 : i32
    %c0_i32_2 = arith.constant 0 : i32
    return %arg0, %c0_i32, %c0_i32_0, %c0_i32_1 : i32, i32, i32, i32
  }
  func.func @transform_1(%arg0: i32, %arg1: i32) -> (i32, i32) {
    %c0_i32 = arith.constant 0 : i32
    %c0_i32_0 = arith.constant 0 : i32
    %c0_i32_1 = arith.constant 0 : i32
    return %c0_i32, %c0_i32_0 : i32, i32
  }
  func.func @transform_2(%arg0: i32, %arg1: i32) -> (i32, i32) {
    %c0_i32 = arith.constant 0 : i32
    %c0_i32_0 = arith.constant 0 : i32
    %c0_i32_1 = arith.constant 0 : i32
    return %c0_i32, %c0_i32_0 : i32, i32
  }
  func.func @transform_3(%arg0: i32, %arg1: i32) -> (i32, i32) {
    %c0_i32 = arith.constant 0 : i32
    %c0_i32_0 = arith.constant 0 : i32
    %c0_i32_1 = arith.constant 0 : i32
    return %c0_i32, %c0_i32_0 : i32, i32
  }
  func.func @transform_4(%arg0: i32, %arg1: i32) -> (i32, i32, i32, i32) {
    %c0_i32 = arith.constant 0 : i32
    %c0_i32_0 = arith.constant 0 : i32
    %c0_i32_1 = arith.constant 0 : i32
    return %arg0, %arg1, %c0_i32, %c0_i32_0 : i32, i32, i32, i32
  }
}

module attributes {stable_mosaic.version = 11 : i64} {
  func.func @_mm_bn_ds_res_relu_kernel(%arg0: i32, %arg1: memref<128x128xbf16, #tpu.memory_space<vmem>>, %arg2: memref<128x128xbf16, #tpu.memory_space<vmem>>, %arg3: memref<1x128xf32, #tpu.memory_space<vmem>>, %arg4: memref<1x128xf32, #tpu.memory_space<vmem>>, %arg5: memref<128x128xbf16, #tpu.memory_space<vmem>>, %arg6: memref<128x128xbf16, #tpu.memory_space<vmem>>, %arg7: memref<1x128xf32, #tpu.memory_space<vmem>>, %arg8: memref<1x128xf32, #tpu.memory_space<vmem>>, %arg9: memref<128x128xbf16, #tpu.memory_space<vmem>>) attributes {dimension_semantics = [#tpu.dimension_semantics<parallel>], iteration_bounds = array<i64: 1>, scalar_prefetch = 0 : i64, scratch_operands = 0 : i64, tpu.core_type = #tpu.core_type<tc>, window_params = [{transform_indices = @transform_0, window_bounds = array<i64: 128, 128>}, {pipeline_mode = #tpu.pipeline_mode<synchronous>, transform_indices = @transform_1, window_bounds = array<i64: 128, 128>}, {pipeline_mode = #tpu.pipeline_mode<synchronous>, transform_indices = @transform_2, window_bounds = array<i64: 1, 128>}, {pipeline_mode = #tpu.pipeline_mode<synchronous>, transform_indices = @transform_3, window_bounds = array<i64: 1, 128>}, {transform_indices = @transform_4, window_bounds = array<i64: 128, 128>}, {pipeline_mode = #tpu.pipeline_mode<synchronous>, transform_indices = @transform_5, window_bounds = array<i64: 128, 128>}, {pipeline_mode = #tpu.pipeline_mode<synchronous>, transform_indices = @transform_6, window_bounds = array<i64: 1, 128>}, {pipeline_mode = #tpu.pipeline_mode<synchronous>, transform_indices = @transform_7, window_bounds = array<i64: 1, 128>}, {transform_indices = @transform_8, window_bounds = array<i64: 128, 128>}]} {
    %c0 = arith.constant 0 : index
    %c0_0 = arith.constant 0 : index
    %0 = vector.load %arg1[%c0, %c0_0] : memref<128x128xbf16, #tpu.memory_space<vmem>>, vector<128x128xbf16>
    %c0_1 = arith.constant 0 : index
    %c0_2 = arith.constant 0 : index
    %1 = vector.load %arg2[%c0_1, %c0_2] : memref<128x128xbf16, #tpu.memory_space<vmem>>, vector<128x128xbf16>
    %cst = arith.constant dense<0.000000e+00> : vector<128x128xf32>
    %2 = tpu.matmul %0, %1, %cst {dimension_numbers = #tpu.dot_dimension_numbers<[1], [0], [0], [1], [0, 0, 1, 1], [], []>} : vector<128x128xbf16>, vector<128x128xbf16>, vector<128x128xf32> -> vector<128x128xf32>
    %c0_3 = arith.constant 0 : index
    %c0_4 = arith.constant 0 : index
    %3 = vector.load %arg3[%c0_3, %c0_4] : memref<1x128xf32, #tpu.memory_space<vmem>>, vector<1x128xf32>
    %4 = vector.broadcast %3 : vector<1x128xf32> to vector<128x128xf32>
    %5 = arith.mulf %2, %4 : vector<128x128xf32>
    %c0_5 = arith.constant 0 : index
    %c0_6 = arith.constant 0 : index
    %6 = vector.load %arg4[%c0_5, %c0_6] : memref<1x128xf32, #tpu.memory_space<vmem>>, vector<1x128xf32>
    %7 = vector.broadcast %6 : vector<1x128xf32> to vector<128x128xf32>
    %8 = arith.addf %5, %7 : vector<128x128xf32>
    %c0_7 = arith.constant 0 : index
    %c0_8 = arith.constant 0 : index
    %9 = vector.load %arg5[%c0_7, %c0_8] : memref<128x128xbf16, #tpu.memory_space<vmem>>, vector<128x128xbf16>
    %c0_9 = arith.constant 0 : index
    %c0_10 = arith.constant 0 : index
    %10 = vector.load %arg6[%c0_9, %c0_10] : memref<128x128xbf16, #tpu.memory_space<vmem>>, vector<128x128xbf16>
    %cst_11 = arith.constant dense<0.000000e+00> : vector<128x128xf32>
    %11 = tpu.matmul %9, %10, %cst_11 {dimension_numbers = #tpu.dot_dimension_numbers<[1], [0], [0], [1], [0, 0, 1, 1], [], []>} : vector<128x128xbf16>, vector<128x128xbf16>, vector<128x128xf32> -> vector<128x128xf32>
    %c0_12 = arith.constant 0 : index
    %c0_13 = arith.constant 0 : index
    %12 = vector.load %arg7[%c0_12, %c0_13] : memref<1x128xf32, #tpu.memory_space<vmem>>, vector<1x128xf32>
    %13 = vector.broadcast %12 : vector<1x128xf32> to vector<128x128xf32>
    %14 = arith.mulf %11, %13 : vector<128x128xf32>
    %c0_14 = arith.constant 0 : index
    %c0_15 = arith.constant 0 : index
    %15 = vector.load %arg8[%c0_14, %c0_15] : memref<1x128xf32, #tpu.memory_space<vmem>>, vector<1x128xf32>
    %16 = vector.broadcast %15 : vector<1x128xf32> to vector<128x128xf32>
    %17 = arith.addf %14, %16 : vector<128x128xf32>
    %18 = arith.addf %8, %17 : vector<128x128xf32>
    %cst_16 = arith.constant 0.000000e+00 : f32
    %19 = vector.broadcast %cst_16 : f32 to vector<128x128xf32>
    %20 = arith.maximumf %18, %19 : vector<128x128xf32>
    %21 = arith.truncf %20 : vector<128x128xf32> to vector<128x128xbf16>
    %c0_17 = arith.constant 0 : index
    %c0_18 = arith.constant 0 : index
    %22 = vector.load %arg9[%c0_17, %c0_18] : memref<128x128xbf16, #tpu.memory_space<vmem>>, vector<128x128xbf16>
    tpu.vector_store %arg9[%c0_17, %c0_18], %21 {strides = array<i32>} : memref<128x128xbf16, #tpu.memory_space<vmem>>, vector<128x128xbf16>,
    return
  }
  func.func @transform_0(%arg0: i32) -> (i32, i32) {
    %c0_i32 = arith.constant 0 : i32
    %c0_i32_0 = arith.constant 0 : i32
    return %arg0, %c0_i32 : i32, i32
  }
  func.func @transform_1(%arg0: i32) -> (i32, i32) {
    %c0_i32 = arith.constant 0 : i32
    %c0_i32_0 = arith.constant 0 : i32
    %c0_i32_1 = arith.constant 0 : i32
    return %c0_i32, %c0_i32_0 : i32, i32
  }
  func.func @transform_2(%arg0: i32) -> (i32, i32) {
    %c0_i32 = arith.constant 0 : i32
    %c0_i32_0 = arith.constant 0 : i32
    %c0_i32_1 = arith.constant 0 : i32
    return %c0_i32, %c0_i32_0 : i32, i32
  }
  func.func @transform_3(%arg0: i32) -> (i32, i32) {
    %c0_i32 = arith.constant 0 : i32
    %c0_i32_0 = arith.constant 0 : i32
    %c0_i32_1 = arith.constant 0 : i32
    return %c0_i32, %c0_i32_0 : i32, i32
  }
  func.func @transform_4(%arg0: i32) -> (i32, i32) {
    %c0_i32 = arith.constant 0 : i32
    %c0_i32_0 = arith.constant 0 : i32
    return %arg0, %c0_i32 : i32, i32
  }
  func.func @transform_5(%arg0: i32) -> (i32, i32) {
    %c0_i32 = arith.constant 0 : i32
    %c0_i32_0 = arith.constant 0 : i32
    %c0_i32_1 = arith.constant 0 : i32
    return %c0_i32, %c0_i32_0 : i32, i32
  }
  func.func @transform_6(%arg0: i32) -> (i32, i32) {
    %c0_i32 = arith.constant 0 : i32
    %c0_i32_0 = arith.constant 0 : i32
    %c0_i32_1 = arith.constant 0 : i32
    return %c0_i32, %c0_i32_0 : i32, i32
  }
  func.func @transform_7(%arg0: i32) -> (i32, i32) {
    %c0_i32 = arith.constant 0 : i32
    %c0_i32_0 = arith.constant 0 : i32
    %c0_i32_1 = arith.constant 0 : i32
    return %c0_i32, %c0_i32_0 : i32, i32
  }
  func.func @transform_8(%arg0: i32) -> (i32, i32) {
    %c0_i32 = arith.constant 0 : i32
    %c0_i32_0 = arith.constant 0 : i32
    return %arg0, %c0_i32 : i32, i32
  }
}

</mosaic_0001>

<bundles_post_ra>
// kernel: bottleneck_forward.3
= control target key start
LH: loop header
LB: loop body
LE: loop exit
PB: predicated region body
PF: predicated region fallthrough
CT: control target
= control target key end

     0   :  { %s1634_s1 = inlined_call_operand.vmem [shape: bf16[128,128], index: 1, kind: input, shape index: {}]   ;;  %s1635_s2 = inlined_call_operand.vmem [shape: f32[1,128], index: 2, kind: input, shape index: {}]   ;;  %s1636_s3 = inlined_call_operand.vmem [shape: f32[1,128], index: 3, kind: input, shape index: {}]   ;;  %s1637_s0 = inlined_call_operand.vmem [shape: bf16[512,128], index: 0, kind: input, shape index: {}]   ;;  %s1638_s4 = inlined_call_operand.vmem [shape: bf16[512,128], index: 4, kind: output, shape index: {}]  }
   0x1   :  { %v1037_v0 = vld [vmem:[%s1634_s1 + $0x38] sm:$0xff]  ;;  %v1036_v1 = vld [vmem:[%s1634_s1 + $0x30] sm:$0xff]  ;;  %v1035_v2 = vld [vmem:[%s1634_s1 + $0x28] sm:$0xff] }
   0x2   :  { %337 = vmatpush.bf16.msra.mxu0 %v1037_v0  ;;  %1229 = vmatpush.bf16.msra.mxu1 %v1037_v0  ;;  %v1034_v3 = vld [vmem:[%s1634_s1 + $0x20] sm:$0xff]  ;;  %v1033_v4 = vld [vmem:[%s1634_s1 + $0x18] sm:$0xff]  ;;  %v1032_v5 = vld [vmem:[%s1634_s1 + $0x10] sm:$0xff] }
   0x3   :  { %1230 = vmatpush.bf16.msra.mxu2 %v1037_v0  ;;  %1231 = vmatpush.bf16.msra.mxu3 %v1037_v0  ;;  %v1031_v6 = vld [vmem:[%s1634_s1 + $0x8] sm:$0xff]  ;;  %v1030_v7 = vld [vmem:[%s1634_s1] sm:$0xff]  ;;  %v1000_v16 = vld [vmem:[%s1637_s0 + $0x10] sm:$0xff] }
   0x4   :  { %v998_v8 = vld [vmem:[%s1637_s0] sm:$0xff]  ;;  %v999_v12 = vld [vmem:[%s1637_s0 + $0x8] sm:$0xff]  ;;  %v1008_v17 = vld [vmem:[%s1637_s0 + $0x50] sm:$0xff] }
   0x5   :  { %v1006_v9 = vld [vmem:[%s1637_s0 + $0x40] sm:$0xff]  ;;  %v1007_v13 = vld [vmem:[%s1637_s0 + $0x48] sm:$0xff]  ;;  %v1016_v18 = vld [vmem:[%s1637_s0 + $0x90] sm:$0xff] }
   0x6   :  { %338 = vmatpush.bf16.msra.mxu0 %v1036_v1  ;;  %1232 = vmatpush.bf16.msra.mxu1 %v1036_v1  ;;  %v1014_v10 = vld [vmem:[%s1637_s0 + $0x80] sm:$0xff]  ;;  %v1015_v14 = vld [vmem:[%s1637_s0 + $0x88] sm:$0xff]  ;;  %v1024_v19 = vld [vmem:[%s1637_s0 + $0xd0] sm:$0xff] }
   0x7   :  { %1233 = vmatpush.bf16.msra.mxu2 %v1036_v1  ;;  %1234 = vmatpush.bf16.msra.mxu3 %v1036_v1  ;;  %v1022_v11 = vld [vmem:[%s1637_s0 + $0xc0] sm:$0xff]  ;;  %v1023_v15 = vld [vmem:[%s1637_s0 + $0xc8] sm:$0xff]  ;;  %v1001_v20 = vld [vmem:[%s1637_s0 + $0x18] sm:$0xff] }
   0x8   :  { %v1009_v21 = vld [vmem:[%s1637_s0 + $0x58] sm:$0xff]  ;;  %v1002_v24 = vld [vmem:[%s1637_s0 + $0x20] sm:$0xff]  ;;  %v1003_v28 = vld [vmem:[%s1637_s0 + $0x28] sm:$0xff] }
   0x9   :  { %v1017_v22 = vld [vmem:[%s1637_s0 + $0x98] sm:$0xff]  ;;  %v1010_v25 = vld [vmem:[%s1637_s0 + $0x60] sm:$0xff]  ;;  %v1011_v29 = vld [vmem:[%s1637_s0 + $0x68] sm:$0xff] }
   0xa   :  { %339 = vmatpush.bf16.msra.mxu0 %v1035_v2  ;;  %1235 = vmatpush.bf16.msra.mxu1 %v1035_v2  ;;  %v1025_v23 = vld [vmem:[%s1637_s0 + $0xd8] sm:$0xff]  ;;  %v1018_v26 = vld [vmem:[%s1637_s0 + $0xa0] sm:$0xff]  ;;  %v1019_v30 = vld [vmem:[%s1637_s0 + $0xa8] sm:$0xff] }
   0xb   :  { %1236 = vmatpush.bf16.msra.mxu2 %v1035_v2  ;;  %1237 = vmatpush.bf16.msra.mxu3 %v1035_v2  ;;  %v1026_v27 = vld [vmem:[%s1637_s0 + $0xe0] sm:$0xff]  ;;  %v1027_v31 = vld [vmem:[%s1637_s0 + $0xe8] sm:$0xff]  ;;  %v1004_v32 = vld [vmem:[%s1637_s0 + $0x30] sm:$0xff] }
   0xc   :  { %v1012_v33 = vld [vmem:[%s1637_s0 + $0x70] sm:$0xff]  ;;  %v1005_v36 = vld [vmem:[%s1637_s0 + $0x38] sm:$0xff]  ;;  %v1403_v42 = vld [vmem:[%s1635_s2] ss:$0 sm:$0xff] }
   0xd   :  { %v1020_v34 = vld [vmem:[%s1637_s0 + $0xb0] sm:$0xff]  ;;  %v1013_v37 = vld [vmem:[%s1637_s0 + $0x78] sm:$0xff]  ;;  %v1409_v44 = vld [vmem:[%s1636_s3] ss:$0 sm:$0xff] }
   0xe   :  { %340 = vmatpush.bf16.msra.mxu0 %v1034_v3  ;;  %1238 = vmatpush.bf16.msra.mxu1 %v1034_v3  ;;  %v1028_v35 = vld [vmem:[%s1637_s0 + $0xf0] sm:$0xff]  ;;  %v1021_v38 = vld [vmem:[%s1637_s0 + $0xb8] sm:$0xff] }
   0xf   :  { %1239 = vmatpush.bf16.msra.mxu2 %v1034_v3  ;;  %1240 = vmatpush.bf16.msra.mxu3 %v1034_v3  ;;  %v1029_v39 = vld [vmem:[%s1637_s0 + $0xf8] sm:$0xff] }
  0x12   :  { %341 = vmatpush.bf16.msra.mxu0 %v1033_v4  ;;  %1241 = vmatpush.bf16.msra.mxu1 %v1033_v4 }
  0x13   :  { %1242 = vmatpush.bf16.msra.mxu2 %v1033_v4  ;;  %1243 = vmatpush.bf16.msra.mxu3 %v1033_v4 }
  0x16   :  { %342 = vmatpush.bf16.msra.mxu0 %v1032_v5  ;;  %1244 = vmatpush.bf16.msra.mxu1 %v1032_v5 }
  0x17   :  { %1245 = vmatpush.bf16.msra.mxu2 %v1032_v5  ;;  %1246 = vmatpush.bf16.msra.mxu3 %v1032_v5 }
  0x1a   :  { %343 = vmatpush.bf16.msra.mxu0 %v1031_v6  ;;  %1247 = vmatpush.bf16.msra.mxu1 %v1031_v6 }
  0x1b   :  { %1248 = vmatpush.bf16.msra.mxu2 %v1031_v6  ;;  %1249 = vmatpush.bf16.msra.mxu3 %v1031_v6 }
  0x1e   :  { %344 = vmatpush.bf16.msra.mxu0 %v1030_v7  ;;  %1250 = vmatpush.bf16.msra.mxu1 %v1030_v7 }
  0x1f   :  { %1251 = vmatpush.bf16.msra.mxu2 %v1030_v7  ;;  %1252 = vmatpush.bf16.msra.mxu3 %v1030_v7 }
  0x21   :  { %345 = vmatmul.bf16.vlgmr.msra.gmra.mxu0 %v998_v8  ;;  %385 = vmatmul.bf16.vlgmr.msra.gmra.mxu1 %v1006_v9 }
  0x22   :  { %425 = vmatmul.bf16.vlgmr.msra.gmra.mxu2 %v1014_v10  ;;  %465 = vmatmul.bf16.vlgmr.msra.gmra.mxu3 %v1022_v11 }
  0x31   :  { %350 = vmatmul.bf16.gmra.mxu0 %v999_v12  ;;  %390 = vmatmul.bf16.gmra.mxu1 %v1007_v13 }
  0x32   :  { %430 = vmatmul.bf16.gmra.mxu2 %v1015_v14  ;;  %470 = vmatmul.bf16.gmra.mxu3 %v1023_v15 }
  0x41   :  { %355 = vmatmul.bf16.gmra.mxu0 %v1000_v16  ;;  %395 = vmatmul.bf16.gmra.mxu1 %v1008_v17 }
  0x42   :  { %435 = vmatmul.bf16.gmra.mxu2 %v1016_v18  ;;  %475 = vmatmul.bf16.gmra.mxu3 %v1024_v19 }
  0x51   :  { %360 = vmatmul.bf16.gmra.mxu0 %v1001_v20  ;;  %400 = vmatmul.bf16.gmra.mxu1 %v1009_v21 }
  0x52   :  { %440 = vmatmul.bf16.gmra.mxu2 %v1017_v22  ;;  %480 = vmatmul.bf16.gmra.mxu3 %v1025_v23 }
  0x61   :  { %365 = vmatmul.bf16.gmra.mxu0 %v1002_v24  ;;  %405 = vmatmul.bf16.gmra.mxu1 %v1010_v25 }
  0x62   :  { %445 = vmatmul.bf16.gmra.mxu2 %v1018_v26  ;;  %485 = vmatmul.bf16.gmra.mxu3 %v1026_v27 }
  0x71   :  { %370 = vmatmul.bf16.gmra.mxu0 %v1003_v28  ;;  %410 = vmatmul.bf16.gmra.mxu1 %v1011_v29 }
  0x72   :  { %450 = vmatmul.bf16.gmra.mxu2 %v1019_v30  ;;  %490 = vmatmul.bf16.gmra.mxu3 %v1027_v31 }
  0x81   :  { %375 = vmatmul.bf16.gmra.mxu0 %v1004_v32  ;;  %415 = vmatmul.bf16.gmra.mxu1 %v1012_v33 }
  0x82   :  { %455 = vmatmul.bf16.gmra.mxu2 %v1020_v34  ;;  %495 = vmatmul.bf16.gmra.mxu3 %v1028_v35 }
  0x91   :  { %380 = vmatmul.bf16.gmra.mxu0 %v1005_v36  ;;  %420 = vmatmul.bf16.gmra.mxu1 %v1013_v37 }
  0x92   :  { %460 = vmatmul.bf16.gmra.mxu2 %v1021_v38  ;;  %500 = vmatmul.bf16.gmra.mxu3 %v1029_v39 }
  0x9e   :  { %v346_v40 = vpop.f32.mrf.mxu0  ;;  %v386_v41 = vpop.f32.mrf.mxu1 }
  0x9f   :  { %v510_v43 = vmul.f32 %v1403_v42, %v346_v40  ;;  %v526_v45 = vmul.f32 %v1403_v42, %v386_v41 }
  0xa1   :  { %v578_v50 = vadd.f32 %v1409_v44, %v510_v43  ;;  %v594_v51 = vadd.f32 %v1409_v44, %v526_v45 }
  0xa3   :  { %v642_v58 = vmax.f32 %v578_v50, 0.0  ;;  %v658_v59 = vmax.f32 %v594_v51, 0.0 }
  0xa5   :  { %v426_v46 = vpop.f32.mrf.mxu2  ;;  %v466_v47 = vpop.f32.mrf.mxu3 }
  0xa6   :  { %v348_v48 = vpop.f32.mrf.mxu0  ;;  %v388_v49 = vpop.f32.mrf.mxu1  ;;  %v542_v56 = vmul.f32 %v1403_v42, %v426_v46  ;;  %v558_v57 = vmul.f32 %v1403_v42, %v466_v47 }
  0xa7   :  { %v511_v52 = vmul.f32 %v1403_v42, %v348_v48  ;;  %v527_v53 = vmul.f32 %v1403_v42, %v388_v49 }
  0xa8   :  { %v610_v2 = vadd.f32 %v1409_v44, %v542_v56  ;;  %v626_v3 = vadd.f32 %v1409_v44, %v558_v57 }
  0xa9   :  { %v579_v54 = vadd.f32 %v1409_v44, %v511_v52  ;;  %v595_v55 = vadd.f32 %v1409_v44, %v527_v53 }
  0xaa   :  { %v674_v10 = vmax.f32 %v610_v2, 0.0  ;;  %v690_v11 = vmax.f32 %v626_v3, 0.0 }
  0xab   :  { %v643_v60 = vmax.f32 %v579_v54, 0.0  ;;  %v659_v61 = vmax.f32 %v595_v55, 0.0 }
  0xad   :  { %v1041_v62 = vpack.c.bf16 %v643_v60, %v642_v58  ;;  %v1081_v63 = vpack.c.bf16 %v659_v61, %v658_v59  ;;  %v428_v0 = vpop.f32.mrf.mxu2  ;;  %v468_v1 = vpop.f32.mrf.mxu3 }
  0xae   :  { %v543_v4 = vmul.f32 %v1403_v42, %v428_v0  ;;  %v559_v5 = vmul.f32 %v1403_v42, %v468_v1  ;;  %v351_v6 = vpop.f32.mrf.mxu0  ;;  %v391_v7 = vpop.f32.mrf.mxu1 }
  0xaf   :  { %1042 = vst [vmem:[%s1638_s4] sm:$0xff] %v1041_v62   ;;  %v512_v14 = vmul.f32 %v1403_v42, %v351_v6  ;;  %v528_v15 = vmul.f32 %v1403_v42, %v391_v7 }
  0xb0   :  { %1205 = vst [vmem:[%s1638_s4 + $0x40] sm:$0xff] %v1081_v63   ;;  %v611_v8 = vadd.f32 %v1409_v44, %v543_v4  ;;  %v627_v9 = vadd.f32 %v1409_v44, %v559_v5 }
  0xb1   :  { %v580_v22 = vadd.f32 %v1409_v44, %v512_v14  ;;  %v596_v23 = vadd.f32 %v1409_v44, %v528_v15 }
  0xb2   :  { %v675_v12 = vmax.f32 %v611_v8, 0.0  ;;  %v691_v13 = vmax.f32 %v627_v9, 0.0 }
  0xb3   :  { %v644_v30 = vmax.f32 %v580_v22, 0.0  ;;  %v660_v31 = vmax.f32 %v596_v23, 0.0 }
  0xb4   :  { %v1121_v16 = vpack.c.bf16 %v675_v12, %v674_v10  ;;  %v1161_v17 = vpack.c.bf16 %v691_v13, %v690_v11 }
  0xb5   :  { %v431_v18 = vpop.f32.mrf.mxu2  ;;  %v471_v19 = vpop.f32.mrf.mxu3 }
  0xb6   :  { %1213 = vst [vmem:[%s1638_s4 + $0x80] sm:$0xff] %v1121_v16   ;;  %v353_v20 = vpop.f32.mrf.mxu0  ;;  %v393_v21 = vpop.f32.mrf.mxu1  ;;  %v544_v28 = vmul.f32 %v1403_v42, %v431_v18  ;;  %v560_v29 = vmul.f32 %v1403_v42, %v471_v19 }
  0xb7   :  { %1221 = vst [vmem:[%s1638_s4 + $0xc0] sm:$0xff] %v1161_v17   ;;  %v513_v24 = vmul.f32 %v1403_v42, %v353_v20  ;;  %v529_v25 = vmul.f32 %v1403_v42, %v393_v21 }
  0xb8   :  { %v612_v38 = vadd.f32 %v1409_v44, %v544_v28  ;;  %v628_v39 = vadd.f32 %v1409_v44, %v560_v29 }
  0xb9   :  { %v581_v26 = vadd.f32 %v1409_v44, %v513_v24  ;;  %v597_v27 = vadd.f32 %v1409_v44, %v529_v25 }
  0xba   :  { %v676_v48 = vmax.f32 %v612_v38, 0.0  ;;  %v692_v49 = vmax.f32 %v628_v39, 0.0 }
  0xbb   :  { %v645_v32 = vmax.f32 %v581_v26, 0.0  ;;  %v661_v33 = vmax.f32 %v597_v27, 0.0 }
  0xbd   :  { %v1046_v34 = vpack.c.bf16 %v645_v32, %v644_v30  ;;  %v1086_v35 = vpack.c.bf16 %v661_v33, %v660_v31  ;;  %v433_v36 = vpop.f32.mrf.mxu2  ;;  %v473_v37 = vpop.f32.mrf.mxu3 }
  0xbe   :  { %v545_v40 = vmul.f32 %v1403_v42, %v433_v36  ;;  %v561_v41 = vmul.f32 %v1403_v42, %v473_v37  ;;  %v356_v43 = vpop.f32.mrf.mxu0  ;;  %v396_v45 = vpop.f32.mrf.mxu1 }
  0xbf   :  { %1198 = vst [vmem:[%s1638_s4 + $0x8] sm:$0xff] %v1046_v34   ;;  %v514_v52 = vmul.f32 %v1403_v42, %v356_v43  ;;  %v530_v53 = vmul.f32 %v1403_v42, %v396_v45 }
  0xc0   :  { %1206 = vst [vmem:[%s1638_s4 + $0x48] sm:$0xff] %v1086_v35   ;;  %v613_v46 = vadd.f32 %v1409_v44, %v545_v40  ;;  %v629_v47 = vadd.f32 %v1409_v44, %v561_v41 }
  0xc1   :  { %v582_v60 = vadd.f32 %v1409_v44, %v514_v52  ;;  %v598_v61 = vadd.f32 %v1409_v44, %v530_v53 }
  0xc2   :  { %v677_v50 = vmax.f32 %v613_v46, 0.0  ;;  %v693_v51 = vmax.f32 %v629_v47, 0.0 }
  0xc3   :  { %v646_v4 = vmax.f32 %v582_v60, 0.0  ;;  %v662_v5 = vmax.f32 %v598_v61, 0.0 }
  0xc4   :  { %v1126_v54 = vpack.c.bf16 %v677_v50, %v676_v48  ;;  %v1166_v55 = vpack.c.bf16 %v693_v51, %v692_v49 }
  0xc5   :  { %v436_v56 = vpop.f32.mrf.mxu2  ;;  %v476_v57 = vpop.f32.mrf.mxu3 }
  0xc6   :  { %1214 = vst [vmem:[%s1638_s4 + $0x88] sm:$0xff] %v1126_v54   ;;  %v358_v58 = vpop.f32.mrf.mxu0  ;;  %v398_v59 = vpop.f32.mrf.mxu1  ;;  %v546_v2 = vmul.f32 %v1403_v42, %v436_v56  ;;  %v562_v3 = vmul.f32 %v1403_v42, %v476_v57 }
  0xc7   :  { %1222 = vst [vmem:[%s1638_s4 + $0xc8] sm:$0xff] %v1166_v55   ;;  %v515_v62 = vmul.f32 %v1403_v42, %v358_v58  ;;  %v531_v63 = vmul.f32 %v1403_v42, %v398_v59 }
  0xc8   :  { %v614_v12 = vadd.f32 %v1409_v44, %v546_v2  ;;  %v630_v13 = vadd.f32 %v1409_v44, %v562_v3 }
  0xc9   :  { %v583_v0 = vadd.f32 %v1409_v44, %v515_v62  ;;  %v599_v1 = vadd.f32 %v1409_v44, %v531_v63 }
  0xca   :  { %v678_v20 = vmax.f32 %v614_v12, 0.0  ;;  %v694_v21 = vmax.f32 %v630_v13, 0.0 }
  0xcb   :  { %v647_v6 = vmax.f32 %v583_v0, 0.0  ;;  %v663_v7 = vmax.f32 %v599_v1, 0.0 }
  0xcd   :  { %v1051_v8 = vpack.c.bf16 %v647_v6, %v646_v4  ;;  %v1091_v9 = vpack.c.bf16 %v663_v7, %v662_v5  ;;  %v438_v10 = vpop.f32.mrf.mxu2  ;;  %v478_v11 = vpop.f32.mrf.mxu3 }
  0xce   :  { %v547_v14 = vmul.f32 %v1403_v42, %v438_v10  ;;  %v563_v15 = vmul.f32 %v1403_v42, %v478_v11  ;;  %v361_v16 = vpop.f32.mrf.mxu0  ;;  %v401_v17 = vpop.f32.mrf.mxu1 }
  0xcf   :  { %1199 = vst [vmem:[%s1638_s4 + $0x10] sm:$0xff] %v1051_v8   ;;  %v516_v24 = vmul.f32 %v1403_v42, %v361_v16  ;;  %v532_v25 = vmul.f32 %v1403_v42, %v401_v17 }
  0xd0   :  { %1207 = vst [vmem:[%s1638_s4 + $0x50] sm:$0xff] %v1091_v9   ;;  %v615_v18 = vadd.f32 %v1409_v44, %v547_v14  ;;  %v631_v19 = vadd.f32 %v1409_v44, %v563_v15 }
  0xd1   :  { %v584_v32 = vadd.f32 %v1409_v44, %v516_v24  ;;  %v600_v33 = vadd.f32 %v1409_v44, %v532_v25 }
  0xd2   :  { %v679_v22 = vmax.f32 %v615_v18, 0.0  ;;  %v695_v23 = vmax.f32 %v631_v19, 0.0 }
  0xd3   :  { %v648_v40 = vmax.f32 %v584_v32, 0.0  ;;  %v664_v41 = vmax.f32 %v600_v33, 0.0 }
  0xd4   :  { %v1131_v26 = vpack.c.bf16 %v679_v22, %v678_v20  ;;  %v1171_v27 = vpack.c.bf16 %v695_v23, %v694_v21 }
  0xd5   :  { %v441_v28 = vpop.f32.mrf.mxu2  ;;  %v481_v29 = vpop.f32.mrf.mxu3 }
  0xd6   :  { %1215 = vst [vmem:[%s1638_s4 + $0x90] sm:$0xff] %v1131_v26   ;;  %v363_v30 = vpop.f32.mrf.mxu0  ;;  %v403_v31 = vpop.f32.mrf.mxu1  ;;  %v548_v38 = vmul.f32 %v1403_v42, %v441_v28  ;;  %v564_v39 = vmul.f32 %v1403_v42, %v481_v29 }
  0xd7   :  { %1223 = vst [vmem:[%s1638_s4 + $0xd0] sm:$0xff] %v1171_v27   ;;  %v517_v34 = vmul.f32 %v1403_v42, %v363_v30  ;;  %v533_v35 = vmul.f32 %v1403_v42, %v403_v31 }
  0xd8   :  { %v616_v50 = vadd.f32 %v1409_v44, %v548_v38  ;;  %v632_v51 = vadd.f32 %v1409_v44, %v564_v39 }
  0xd9   :  { %v585_v36 = vadd.f32 %v1409_v44, %v517_v34  ;;  %v601_v37 = vadd.f32 %v1409_v44, %v533_v35 }
  0xda   :  { %v680_v58 = vmax.f32 %v616_v50, 0.0  ;;  %v696_v59 = vmax.f32 %v632_v51, 0.0 }
  0xdb   :  { %v649_v43 = vmax.f32 %v585_v36, 0.0  ;;  %v665_v45 = vmax.f32 %v601_v37, 0.0 }
  0xdd   :  { %v1056_v46 = vpack.c.bf16 %v649_v43, %v648_v40  ;;  %v1096_v47 = vpack.c.bf16 %v665_v45, %v664_v41  ;;  %v443_v48 = vpop.f32.mrf.mxu2  ;;  %v483_v49 = vpop.f32.mrf.mxu3 }
  0xde   :  { %v549_v52 = vmul.f32 %v1403_v42, %v443_v48  ;;  %v565_v53 = vmul.f32 %v1403_v42, %v483_v49  ;;  %v366_v54 = vpop.f32.mrf.mxu0  ;;  %v406_v55 = vpop.f32.mrf.mxu1 }
  0xdf   :  { %1200 = vst [vmem:[%s1638_s4 + $0x18] sm:$0xff] %v1056_v46   ;;  %v518_v62 = vmul.f32 %v1403_v42, %v366_v54  ;;  %v534_v63 = vmul.f32 %v1403_v42, %v406_v55 }
  0xe0   :  { %1208 = vst [vmem:[%s1638_s4 + $0x58] sm:$0xff] %v1096_v47   ;;  %v617_v56 = vadd.f32 %v1409_v44, %v549_v52  ;;  %v633_v57 = vadd.f32 %v1409_v44, %v565_v53 }
  0xe1   :  { %v586_v6 = vadd.f32 %v1409_v44, %v518_v62  ;;  %v602_v7 = vadd.f32 %v1409_v44, %v534_v63 }
  0xe2   :  { %v681_v60 = vmax.f32 %v617_v56, 0.0  ;;  %v697_v61 = vmax.f32 %v633_v57, 0.0 }
  0xe3   :  { %v650_v14 = vmax.f32 %v586_v6, 0.0  ;;  %v666_v15 = vmax.f32 %v602_v7, 0.0 }
  0xe4   :  { %v1136_v0 = vpack.c.bf16 %v681_v60, %v680_v58  ;;  %v1176_v1 = vpack.c.bf16 %v697_v61, %v696_v59 }
  0xe5   :  { %v446_v2 = vpop.f32.mrf.mxu2  ;;  %v486_v3 = vpop.f32.mrf.mxu3 }
  0xe6   :  { %1216 = vst [vmem:[%s1638_s4 + $0x98] sm:$0xff] %v1136_v0   ;;  %v368_v4 = vpop.f32.mrf.mxu0  ;;  %v408_v5 = vpop.f32.mrf.mxu1  ;;  %v550_v12 = vmul.f32 %v1403_v42, %v446_v2  ;;  %v566_v13 = vmul.f32 %v1403_v42, %v486_v3 }
  0xe7   :  { %1224 = vst [vmem:[%s1638_s4 + $0xd8] sm:$0xff] %v1176_v1   ;;  %v519_v8 = vmul.f32 %v1403_v42, %v368_v4  ;;  %v535_v9 = vmul.f32 %v1403_v42, %v408_v5 }
  0xe8   :  { %v618_v22 = vadd.f32 %v1409_v44, %v550_v12  ;;  %v634_v23 = vadd.f32 %v1409_v44, %v566_v13 }
  0xe9   :  { %v587_v10 = vadd.f32 %v1409_v44, %v519_v8  ;;  %v603_v11 = vadd.f32 %v1409_v44, %v535_v9 }
  0xea   :  { %v682_v30 = vmax.f32 %v618_v22, 0.0  ;;  %v698_v31 = vmax.f32 %v634_v23, 0.0 }
  0xeb   :  { %v651_v16 = vmax.f32 %v587_v10, 0.0  ;;  %v667_v17 = vmax.f32 %v603_v11, 0.0 }
  0xed   :  { %v1061_v18 = vpack.c.bf16 %v651_v16, %v650_v14  ;;  %v1101_v19 = vpack.c.bf16 %v667_v17, %v666_v15  ;;  %v448_v20 = vpop.f32.mrf.mxu2  ;;  %v488_v21 = vpop.f32.mrf.mxu3 }
  0xee   :  { %v551_v24 = vmul.f32 %v1403_v42, %v448_v20  ;;  %v567_v25 = vmul.f32 %v1403_v42, %v488_v21  ;;  %v371_v26 = vpop.f32.mrf.mxu0  ;;  %v411_v27 = vpop.f32.mrf.mxu1 }
  0xef   :  { %1201 = vst [vmem:[%s1638_s4 + $0x20] sm:$0xff] %v1061_v18   ;;  %v520_v34 = vmul.f32 %v1403_v42, %v371_v26  ;;  %v536_v35 = vmul.f32 %v1403_v42, %v411_v27 }
  0xf0   :  { %1209 = vst [vmem:[%s1638_s4 + $0x60] sm:$0xff] %v1101_v19   ;;  %v619_v28 = vadd.f32 %v1409_v44, %v551_v24  ;;  %v635_v29 = vadd.f32 %v1409_v44, %v567_v25 }
  0xf1   :  { %v588_v43 = vadd.f32 %v1409_v44, %v520_v34  ;;  %v604_v45 = vadd.f32 %v1409_v44, %v536_v35 }
  0xf2   :  { %v683_v32 = vmax.f32 %v619_v28, 0.0  ;;  %v699_v33 = vmax.f32 %v635_v29, 0.0 }
  0xf3   :  { %v652_v52 = vmax.f32 %v588_v43, 0.0  ;;  %v668_v53 = vmax.f32 %v604_v45, 0.0 }
  0xf4   :  { %v1141_v36 = vpack.c.bf16 %v683_v32, %v682_v30  ;;  %v1181_v37 = vpack.c.bf16 %v699_v33, %v698_v31 }
  0xf5   :  { %v451_v38 = vpop.f32.mrf.mxu2  ;;  %v491_v39 = vpop.f32.mrf.mxu3 }
  0xf6   :  { %1217 = vst [vmem:[%s1638_s4 + $0xa0] sm:$0xff] %v1141_v36   ;;  %v373_v40 = vpop.f32.mrf.mxu0  ;;  %v413_v41 = vpop.f32.mrf.mxu1  ;;  %v552_v50 = vmul.f32 %v1403_v42, %v451_v38  ;;  %v568_v51 = vmul.f32 %v1403_v42, %v491_v39 }
  0xf7   :  { %1225 = vst [vmem:[%s1638_s4 + $0xe0] sm:$0xff] %v1181_v37   ;;  %v521_v46 = vmul.f32 %v1403_v42, %v373_v40  ;;  %v537_v47 = vmul.f32 %v1403_v42, %v413_v41 }
  0xf8   :  { %v620_v60 = vadd.f32 %v1409_v44, %v552_v50  ;;  %v636_v61 = vadd.f32 %v1409_v44, %v568_v51 }
  0xf9   :  { %v589_v48 = vadd.f32 %v1409_v44, %v521_v46  ;;  %v605_v49 = vadd.f32 %v1409_v44, %v537_v47 }
  0xfa   :  { %v684_v4 = vmax.f32 %v620_v60, 0.0  ;;  %v700_v5 = vmax.f32 %v636_v61, 0.0 }
  0xfb   :  { %v653_v54 = vmax.f32 %v589_v48, 0.0  ;;  %v669_v55 = vmax.f32 %v605_v49, 0.0 }
  0xfd   :  { %v1066_v56 = vpack.c.bf16 %v653_v54, %v652_v52  ;;  %v1106_v57 = vpack.c.bf16 %v669_v55, %v668_v53  ;;  %v453_v58 = vpop.f32.mrf.mxu2  ;;  %v493_v59 = vpop.f32.mrf.mxu3 }
  0xfe   :  { %v553_v62 = vmul.f32 %v1403_v42, %v453_v58  ;;  %v569_v63 = vmul.f32 %v1403_v42, %v493_v59  ;;  %v376_v0 = vpop.f32.mrf.mxu0  ;;  %v416_v1 = vpop.f32.mrf.mxu1 }
  0xff   :  { %1202 = vst [vmem:[%s1638_s4 + $0x28] sm:$0xff] %v1066_v56   ;;  %v522_v8 = vmul.f32 %v1403_v42, %v376_v0  ;;  %v538_v9 = vmul.f32 %v1403_v42, %v416_v1 }
 0x100   :  { %1210 = vst [vmem:[%s1638_s4 + $0x68] sm:$0xff] %v1106_v57   ;;  %v621_v2 = vadd.f32 %v1409_v44, %v553_v62  ;;  %v637_v3 = vadd.f32 %v1409_v44, %v569_v63 }
 0x101   :  { %v590_v16 = vadd.f32 %v1409_v44, %v522_v8  ;;  %v606_v17 = vadd.f32 %v1409_v44, %v538_v9 }
 0x102   :  { %v685_v6 = vmax.f32 %v621_v2, 0.0  ;;  %v701_v7 = vmax.f32 %v637_v3, 0.0 }
 0x103   :  { %v654_v24 = vmax.f32 %v590_v16, 0.0  ;;  %v670_v25 = vmax.f32 %v606_v17, 0.0 }
 0x104   :  { %v1146_v10 = vpack.c.bf16 %v685_v6, %v684_v4  ;;  %v1186_v11 = vpack.c.bf16 %v701_v7, %v700_v5 }
 0x105   :  { %v456_v12 = vpop.f32.mrf.mxu2  ;;  %v496_v13 = vpop.f32.mrf.mxu3 }
 0x106   :  { %1218 = vst [vmem:[%s1638_s4 + $0xa8] sm:$0xff] %v1146_v10   ;;  %v378_v14 = vpop.f32.mrf.mxu0  ;;  %v418_v15 = vpop.f32.mrf.mxu1  ;;  %v554_v22 = vmul.f32 %v1403_v42, %v456_v12  ;;  %v570_v23 = vmul.f32 %v1403_v42, %v496_v13 }
 0x107   :  { %1226 = vst [vmem:[%s1638_s4 + $0xe8] sm:$0xff] %v1186_v11   ;;  %v523_v18 = vmul.f32 %v1403_v42, %v378_v14  ;;  %v539_v19 = vmul.f32 %v1403_v42, %v418_v15 }
 0x108   :  { %v622_v32 = vadd.f32 %v1409_v44, %v554_v22  ;;  %v638_v33 = vadd.f32 %v1409_v44, %v570_v23 }
 0x109   :  { %v591_v20 = vadd.f32 %v1409_v44, %v523_v18  ;;  %v607_v21 = vadd.f32 %v1409_v44, %v539_v19 }
 0x10a   :  { %v686_v40 = vmax.f32 %v622_v32, 0.0  ;;  %v702_v41 = vmax.f32 %v638_v33, 0.0 }
 0x10b   :  { %v655_v26 = vmax.f32 %v591_v20, 0.0  ;;  %v671_v27 = vmax.f32 %v607_v21, 0.0 }
 0x10d   :  { %v1071_v28 = vpack.c.bf16 %v655_v26, %v654_v24  ;;  %v1111_v29 = vpack.c.bf16 %v671_v27, %v670_v25  ;;  %v458_v30 = vpop.f32.mrf.mxu2  ;;  %v498_v31 = vpop.f32.mrf.mxu3 }
 0x10e   :  { %v555_v34 = vmul.f32 %v1403_v42, %v458_v30  ;;  %v571_v35 = vmul.f32 %v1403_v42, %v498_v31  ;;  %v381_v36 = vpop.f32.mrf.mxu0  ;;  %v421_v37 = vpop.f32.mrf.mxu1 }
 0x10f   :  { %1203 = vst [vmem:[%s1638_s4 + $0x30] sm:$0xff] %v1071_v28   ;;  %v524_v46 = vmul.f32 %v1403_v42, %v381_v36  ;;  %v540_v47 = vmul.f32 %v1403_v42, %v421_v37 }
 0x110   :  { %1211 = vst [vmem:[%s1638_s4 + $0x70] sm:$0xff] %v1111_v29   ;;  %v623_v38 = vadd.f32 %v1409_v44, %v555_v34  ;;  %v639_v39 = vadd.f32 %v1409_v44, %v571_v35 }
 0x111   :  { %v592_v54 = vadd.f32 %v1409_v44, %v524_v46  ;;  %v608_v55 = vadd.f32 %v1409_v44, %v540_v47 }
 0x112   :  { %v687_v43 = vmax.f32 %v623_v38, 0.0  ;;  %v703_v45 = vmax.f32 %v639_v39, 0.0 }
 0x113   :  { %v656_v62 = vmax.f32 %v592_v54, 0.0  ;;  %v672_v63 = vmax.f32 %v608_v55, 0.0 }
 0x114   :  { %v1151_v48 = vpack.c.bf16 %v687_v43, %v686_v40  ;;  %v1191_v49 = vpack.c.bf16 %v703_v45, %v702_v41 }
 0x115   :  { %v461_v50 = vpop.f32.mrf.mxu2  ;;  %v501_v51 = vpop.f32.mrf.mxu3 }
 0x116   :  { %1219 = vst [vmem:[%s1638_s4 + $0xb0] sm:$0xff] %v1151_v48   ;;  %v383_v52 = vpop.f32.mrf.mxu0  ;;  %v423_v53 = vpop.f32.mrf.mxu1  ;;  %v556_v60 = vmul.f32 %v1403_v42, %v461_v50  ;;  %v572_v61 = vmul.f32 %v1403_v42, %v501_v51 }
 0x117   :  { %1227 = vst [vmem:[%s1638_s4 + $0xf0] sm:$0xff] %v1191_v49   ;;  %v525_v56 = vmul.f32 %v1403_v42, %v383_v52  ;;  %v541_v57 = vmul.f32 %v1403_v42, %v423_v53 }
 0x118   :  { %v624_v6 = vadd.f32 %v1409_v44, %v556_v60  ;;  %v640_v7 = vadd.f32 %v1409_v44, %v572_v61 }
 0x119   :  { %v593_v58 = vadd.f32 %v1409_v44, %v525_v56  ;;  %v609_v59 = vadd.f32 %v1409_v44, %v541_v57 }
 0x11a   :  { %v688_v12 = vmax.f32 %v624_v6, 0.0  ;;  %v704_v13 = vmax.f32 %v640_v7, 0.0 }
 0x11b   :  { %v657_v0 = vmax.f32 %v593_v58, 0.0  ;;  %v673_v1 = vmax.f32 %v609_v59, 0.0 }
 0x11d   :  { %v1076_v2 = vpack.c.bf16 %v657_v0, %v656_v62  ;;  %v1116_v3 = vpack.c.bf16 %v673_v1, %v672_v63  ;;  %v463_v4 = vpop.f32.mrf.mxu2  ;;  %v503_v5 = vpop.f32.mrf.mxu3 }
 0x11e   :  { %v557_v8 = vmul.f32 %v1403_v42, %v463_v4  ;;  %v573_v9 = vmul.f32 %v1403_v42, %v503_v5 }
 0x11f   :  { %1204 = vst [vmem:[%s1638_s4 + $0x38] sm:$0xff] %v1076_v2  }
 0x120   :  { %1212 = vst [vmem:[%s1638_s4 + $0x78] sm:$0xff] %v1116_v3   ;;  %v625_v10 = vadd.f32 %v1409_v44, %v557_v8  ;;  %v641_v11 = vadd.f32 %v1409_v44, %v573_v9 }
 0x122   :  { %v689_v14 = vmax.f32 %v625_v10, 0.0  ;;  %v705_v15 = vmax.f32 %v641_v11, 0.0 }
 0x124   :  { %v1156_v16 = vpack.c.bf16 %v689_v14, %v688_v12  ;;  %v1196_v17 = vpack.c.bf16 %v705_v15, %v704_v13 }
 0x126   :  { %1220 = vst [vmem:[%s1638_s4 + $0xb8] sm:$0xff] %v1156_v16  }
 0x127   :  { %1228 = vst [vmem:[%s1638_s4 + $0xf8] sm:$0xff] %v1196_v17  }

// kernel: bottleneck_forward.4
= control target key start
LH: loop header
LB: loop body
LE: loop exit
PB: predicated region body
PF: predicated region fallthrough
CT: control target
= control target key end

     0   :  { %s2339_s15 = smov 0   ;;  %s2341_s16 = smov 0   ;;  %s2844_s0 = inlined_call_operand.vmem [shape: bf16[2,36,9,128], index: 0, kind: input, shape index: {}]   ;;  %s2845_s1 = inlined_call_operand.vmem [shape: bf16[1152,128], index: 1, kind: input, shape index: {}]   ;;  %s2846_s2 = inlined_call_operand.vmem [shape: f32[1,128], index: 2, kind: input, shape index: {}]   ;;  %s2847_s3 = inlined_call_operand.vmem [shape: f32[1,128], index: 3, kind: input, shape index: {}]   ;;  %s2848_s4 = inlined_call_operand.vmem [shape: bf16[2,8,8,128], index: 4, kind: output, shape index: {}]  }
   0x1   :  { %s2343_s17 = smov 0  }
   0x2 LB: > { %s26_s18 = sadd.s32 1, %s2308_s16  ;;  %p1741_p0 = scmp.ge.s32.totalorder %s2312_s17, 1  ;;  %s2312_s17 = sphi %s2343_s17, %s14_s17   ;;  %s2308_s16 = sphi %s2341_s16, %s2850_s16   ;;  %s2304_s15 = sphi %s2339_s15, %s2849_s15  }
   0x3   : > { %p28_p1 = scmp.ge.s32.totalorder %s26_s18, 2  ;;  %p176_p2 = scmp.lt.s32.totalorder %s2312_s17, 3 }
   0x5   : > { %s2852_s18 = smov (%p28_p1, %s26_s18), 0  ;;  %p177_p3 = pnand %p1741_p0, %p176_p2 }
   0x6   : > { %p206_p4 = scmp.lt.s32.totalorder (!%p177_p3), %s2304_s15, 1 }
   0x7   : > { %180 = sbr.rel (%p177_p3) target bundleno = 339 (0x153), region = 36 }
   0xc   : > { %v2159_v0 = vld [vmem:[%s2845_s1 + $0x38] sm:$0xff]  ;;  %v2158_v2 = vld [vmem:[%s2845_s1 + $0x30] sm:$0xff]  ;;  %s2854_s15 = smov (!%p206_p4, %s2304_s15), 1  ;;  %v2157_v6 = vld [vmem:[%s2845_s1 + $0x28] sm:$0xff] }
   0xd   : > { %v2175_v1 = vld [vmem:[%s2845_s1 + $0xb8] sm:$0xff]  ;;  %2247 = vmatpush.bf16.msra.mxu1 %v2159_v0  ;;  %1325 = vmatpush.bf16.msra.mxu0 %v2159_v0  ;;  %v2174_v3 = vld [vmem:[%s2845_s1 + $0xb0] sm:$0xff]  ;;  %s2263_s29 = smul.u32 288, %s2854_s15  ;;  %v2173_v7 = vld [vmem:[%s2845_s1 + $0xa8] sm:$0xff]  ;;  %s2139_s22 = sshll.u32 %s2854_s15, 5 }
   0xe   : > { %1383 = vmatpush.bf16.msra.mxu2 %v2175_v1  ;;  %v2183_v4 = vld [vmem:[%s2845_s1 + $0xf8] sm:$0xff]  ;;  %v2182_v5 = vld [vmem:[%s2845_s1 + $0xf0] sm:$0xff]  ;;  %v2181_v8 = vld [vmem:[%s2845_s1 + $0xe8] sm:$0xff]  ;;  %s2808_s25 = scalar_lea.vmem %s2848_s4, %s2139_s22 }
   0xf   : > { %1412 = vmatpush.bf16.msra.mxu3 %v2183_v4  ;;  %s2384_s10 = scalar_lea.vmem %s2844_s0, %s2263_s29  ;;  %v2156_v14 = vld [vmem:[%s2845_s1 + $0x20] sm:$0xff]  ;;  %v2155_v22 = vld [vmem:[%s2845_s1 + $0x18] sm:$0xff]  ;;  %v2154_v26 = vld [vmem:[%s2845_s1 + $0x10] sm:$0xff] }
  0x10   : > { %v2393_v9 = vld [vmem:[%s2384_s10] sm:$0xf]  ;;  %v2396_v10 = vld [vmem:[%s2384_s10 + $0x8] sm:$0xf]  ;;  %v245_v11 = vld [vmem:[%s2384_s10 + $0x4] sm:$0x1] }
  0x11   : > { %2248 = vmatpush.bf16.msra.mxu1 %v2158_v2  ;;  %1326 = vmatpush.bf16.msra.mxu0 %v2158_v2  ;;  %v246_v12 = vld [vmem:[%s2384_s10 + $0xc] sm:$0x1]  ;;  %v333_v13 = vunpack.c.l.b16 %v2393_v9  ;;  %v334_v15 = vunpack.c.l.b16 %v245_v11  ;;  %v335_v16 = vunpack.c.l.b16 %v2396_v10  ;;  %v2172_v17 = vld [vmem:[%s2845_s1 + $0xa0] sm:$0xff]  ;;  %v2171_v24 = vld [vmem:[%s2845_s1 + $0x98] sm:$0xff] }
  0x12   : > { %1384 = vmatpush.bf16.msra.mxu2 %v2174_v3  ;;  %v336_v18 = vunpack.c.l.b16 %v246_v12  ;;  %v2180_v20 = vld [vmem:[%s2845_s1 + $0xe0] sm:$0xff]  ;;  %v2179_v27 = vld [vmem:[%s2845_s1 + $0xd8] sm:$0xff]  ;;  %v2428_v28 = vld [vmem:[%s2384_s10 + $0x10] sm:$0xf] }
  0x13   : > { %1413 = vmatpush.bf16.msra.mxu3 %v2182_v5  ;;  %v349_v19 = vpack.c.b16 %v334_v15, %v333_v13  ;;  %v247_v33 = vld [vmem:[%s2384_s10 + $0x14] sm:$0x1]  ;;  %v2435_v35 = vld [vmem:[%s2384_s10 + $0x18] sm:$0xf]  ;;  %v248_v36 = vld [vmem:[%s2384_s10 + $0x1c] sm:$0x1]  ;;  %v337_v38 = vunpack.c.l.b16 %v2428_v28  ;;  %v821_v63 = vpack.c.b16 %v335_v16, %v333_v13 }
  0x14   : > { %v350_v21 = vpack.c.b16 %v336_v18, %v335_v16  ;;  %v2170_v34 = vld [vmem:[%s2845_s1 + $0x90] sm:$0xff]  ;;  %v338_v39 = vunpack.c.l.b16 %v247_v33  ;;  %v2153_v40 = vld [vmem:[%s2845_s1 + $0x8] sm:$0xff]  ;;  %v2446_v41 = vld [vmem:[%s2384_s10 + $0x20] sm:$0xf]  ;;  %v339_v45 = vunpack.c.l.b16 %v2435_v35  ;;  %v340_v46 = vunpack.c.l.b16 %v248_v36 }
  0x15   : > { %2249 = vmatpush.bf16.msra.mxu1 %v2157_v6  ;;  %1327 = vmatpush.bf16.msra.mxu0 %v2157_v6  ;;  %v360_v23 = vshll.u32 %v349_v19, 16  ;;  %v358_v29 = vshrl.u32 %v349_v19, 16  ;;  %v2178_v37 = vld [vmem:[%s2845_s1 + $0xd0] sm:$0xff]  ;;  %v2449_v42 = vld [vmem:[%s2384_s10 + $0x28] sm:$0xf]  ;;  %v341_v48 = vunpack.c.l.b16 %v2446_v41  ;;  %v2152_v51 = vld [vmem:[%s2845_s1] sm:$0xff] }
  0x16   : > { %1385 = vmatpush.bf16.msra.mxu2 %v2173_v7  ;;  %v367_v25 = vshll.u32 %v350_v21, 16  ;;  %v365_v31 = vshrl.u32 %v350_v21, 16  ;;  %v2169_v47 = vld [vmem:[%s2845_s1 + $0x88] sm:$0xff]  ;;  %v343_v49 = vunpack.c.l.b16 %v2449_v42  ;;  %v351_v54 = vpack.c.b16 %v338_v39, %v337_v38  ;;  %v2468_v56 = vld [vmem:[%s2384_s10 + $0x90] sm:$0xf]  ;;  %v2167_v58 = vld [vmem:[%s2845_s1 + $0x78] sm:$0xff] }
  0x17   : > { %1414 = vmatpush.bf16.msra.mxu3 %v2181_v8  ;;  %v362_v30 = vrot.slane %v360_v23, 1  ;;  %v2177_v50 = vld [vmem:[%s2845_s1 + $0xc8] sm:$0xff]  ;;  %v352_v55 = vpack.c.b16 %v340_v46, %v339_v45  ;;  %v2471_v57 = vld [vmem:[%s2384_s10 + $0x98] sm:$0xf]  ;;  %v2168_v59 = vld [vmem:[%s2845_s1 + $0x80] sm:$0xff]  ;;  %v429_v0 = vunpack.c.l.b16 %v2468_v56  ;;  %v830_v46 = vpack.c.b16 %v339_v45, %v337_v38 }
  0x18   : > { %v369_v32 = vrot.slane %v367_v25, 1  ;;  %v2191_v60 = vld [vmem:[%s2845_s1 + $0x138] sm:$0xff]  ;;  %v839_v62 = vpack.c.b16 %v343_v49, %v341_v48  ;;  %v431_v1 = vunpack.c.l.b16 %v2471_v57  ;;  %v2176_v3 = vld [vmem:[%s2845_s1 + $0xc0] sm:$0xff]  ;;  %v374_v4 = vshll.u32 %v351_v54, 16  ;;  %v2166_v6 = vld [vmem:[%s2845_s1 + $0x70] sm:$0xff] }
  0x19   : > { %2250 = vmatpush.bf16.msra.mxu1 %v2156_v14  ;;  %1328 = vmatpush.bf16.msra.mxu0 %v2156_v14  ;;  %v363_v43 = vor.u32 %v362_v30, %v358_v29  ;;  %v2207_v61 = vld [vmem:[%s2845_s1 + $0x1b8] sm:$0xff]  ;;  %v381_v5 = vshll.u32 %v352_v55, 16  ;;  %v2190_v8 = vld [vmem:[%s2845_s1 + $0x130] sm:$0xff]  ;;  %v372_v11 = vshrl.u32 %v351_v54, 16  ;;  %v379_v13 = vshrl.u32 %v352_v55, 16  ;;  %v2189_v18 = vld [vmem:[%s2845_s1 + $0x128] sm:$0xff] }
  0x1a   : > { %1386 = vmatpush.bf16.msra.mxu2 %v2172_v17  ;;  %v370_v44 = vor.u32 %v369_v32, %v365_v31  ;;  %v2215_v7 = vld [vmem:[%s2845_s1 + $0x1f8] sm:$0xff]  ;;  %v2206_v9 = vld [vmem:[%s2845_s1 + $0x1b0] sm:$0xff]  ;;  %v824_v10 = vpack.c.b16 %v431_v1, %v429_v0  ;;  %v376_v12 = vrot.slane %v374_v4, 1  ;;  %v249_v15 = vld [vmem:[%s2384_s10 + $0x24] sm:$0x1] }
  0x1b   : > { %1415 = vmatpush.bf16.msra.mxu3 %v2180_v20  ;;  %v630_v52 = vunpack.c.l.b16 %v363_v43  ;;  %v383_v14 = vrot.slane %v381_v5, 1  ;;  %v250_v16 = vld [vmem:[%s2384_s10 + $0x2c] sm:$0x1]  ;;  %v2214_v20 = vld [vmem:[%s2845_s1 + $0x1f0] sm:$0xff]  ;;  %v342_v21 = vunpack.c.l.b16 %v249_v15  ;;  %v2188_v30 = vld [vmem:[%s2845_s1 + $0x120] sm:$0xff] }
  0x1c   : > { %v636_v53 = vunpack.c.l.b16 %v370_v44  ;;  %v2165_v17 = vld [vmem:[%s2845_s1 + $0x68] sm:$0xff]  ;;  %v2529_v23 = vld [vmem:[%s2384_s10 + $0x30] sm:$0xf]  ;;  %v377_v25 = vor.u32 %v376_v12, %v372_v11  ;;  %v2204_v31 = vld [vmem:[%s2845_s1 + $0x1a0] sm:$0xff] }
  0x1d   : > { %2251 = vmatpush.bf16.msra.mxu1 %v2155_v22  ;;  %1329 = vmatpush.bf16.msra.mxu0 %v2155_v22  ;;  %v2205_v19 = vld [vmem:[%s2845_s1 + $0x1a8] sm:$0xff]  ;;  %v344_v22 = vunpack.c.l.b16 %v250_v16  ;;  %v345_v32 = vunpack.c.l.b16 %v2529_v23  ;;  %v2163_v44 = vld [vmem:[%s2845_s1 + $0x58] sm:$0xff]  ;;  %v2186_v28 = vld [vmem:[%s2845_s1 + $0x110] sm:$0xff] }
  0x1e   : > { %1387 = vmatpush.bf16.msra.mxu2 %v2171_v24  ;;  %v823_v2 = vpack.c.b16 %v636_v53, %v630_v52  ;;  %v2532_v24 = vld [vmem:[%s2384_s10 + $0x38] sm:$0xf]  ;;  %v2213_v29 = vld [vmem:[%s2845_s1 + $0x1e8] sm:$0xff]  ;;  %v2162_v52 = vld [vmem:[%s2845_s1 + $0x50] sm:$0xff] }
  0x1f   : > { %1416 = vmatpush.bf16.msra.mxu3 %v2179_v27  ;;  %v2164_v27 = vld [vmem:[%s2845_s1 + $0x60] sm:$0xff]  ;;  %v347_v33 = vunpack.c.l.b16 %v2532_v24  ;;  %v354_v36 = vpack.c.b16 %v344_v22, %v343_v49  ;;  %v2556_v43 = vld [vmem:[%s2384_s10 + $0xa8] sm:$0xf]  ;;  %v2187_v41 = vld [vmem:[%s2845_s1 + $0x118] sm:$0xff] }
  0x20   : > { %v2203_v38 = vld [vmem:[%s2845_s1 + $0x198] sm:$0xff]  ;;  %v251_v45 = vld [vmem:[%s2384_s10 + $0x34] sm:$0x1]  ;;  %v2184_v12 = vld [vmem:[%s2845_s1 + $0x100] sm:$0xff] }
  0x21   : > { %2252 = vmatpush.bf16.msra.mxu1 %v2154_v26  ;;  %1330 = vmatpush.bf16.msra.mxu0 %v2154_v26  ;;  %v384_v26 = vor.u32 %v383_v14, %v379_v13  ;;  %v848_v42 = vpack.c.b16 %v347_v33, %v345_v32  ;;  %v393_v55 = vshrl.u32 %v354_v36, 16  ;;  %v2199_v11 = vld [vmem:[%s2845_s1 + $0x178] sm:$0xff]  ;;  %v2140_v13 = vld [vmem:[%s2384_s10 + $0x4c] sm:$0xf0] }
  0x22   : > { %1388 = vmatpush.bf16.msra.mxu2 %v2170_v34  ;;  %v353_v34 = vpack.c.b16 %v342_v21, %v341_v48  ;;  %v435_v48 = vunpack.c.l.b16 %v2556_v43  ;;  %v1807_v14 = vld [vmem:[%s2384_s10 + $0xd8] sm:$0xf]  ;;  %v2619_v21 = vld [vmem:[%s2384_s10 + $0xb0] sm:$0xf] }
  0x23   : > { %1417 = vmatpush.bf16.msra.mxu3 %v2178_v37  ;;  %v642_v37 = vunpack.c.l.b16 %v377_v25  ;;  %v648_v39 = vunpack.c.l.b16 %v384_v26  ;;  %v2223_v15 = vld [vmem:[%s2845_s1 + $0x238] sm:$0xff]  ;;  %v2198_v25 = vld [vmem:[%s2845_s1 + $0x170] sm:$0xff] }
  0x24   : > { %v386_v53 = vshrl.u32 %v353_v34, 16  ;;  %v2622_v22 = vld [vmem:[%s2384_s10 + $0xb8] sm:$0xf] }
  0x25   : > { %2253 = vmatpush.bf16.msra.mxu1 %v2153_v40  ;;  %1331 = vmatpush.bf16.msra.mxu0 %v2153_v40  ;;  %v2553_v40 = vld [vmem:[%s2384_s10 + $0xa0] sm:$0xf]  ;;  %v832_v49 = vpack.c.b16 %v648_v39, %v642_v37  ;;  %v2197_v39 = vld [vmem:[%s2845_s1 + $0x168] sm:$0xff] }
  0x26   : > { %1389 = vmatpush.bf16.msra.mxu2 %v2169_v47  ;;  %v433_v47 = vunpack.c.l.b16 %v2553_v40 }
  0x27   : > { %1418 = vmatpush.bf16.msra.mxu3 %v2177_v50  ;;  %v388_v50 = vshll.u32 %v353_v34, 16  ;;  %v2222_v34 = vld [vmem:[%s2845_s1 + $0x230] sm:$0xff] }
  0x28   : > { %v833_v35 = vpack.c.b16 %v435_v48, %v433_v47 }
  0x29   : > { %2254 = vmatpush.bf16.msra.mxu1 %v2152_v51  ;;  %1332 = vmatpush.bf16.msra.mxu0 %v2152_v51  ;;  %v395_v51 = vshll.u32 %v354_v36, 16  ;;  %v390_v54 = vrot.slane %v388_v50, 1 }
  0x2a   : > { %1390 = vmatpush.bf16.msra.mxu2 %v2168_v59  ;;  %v252_v59 = vld [vmem:[%s2384_s10 + $0x3c] sm:$0x1] }
  0x2b   : > { %1419 = vmatpush.bf16.msra.mxu3 %v2176_v3  ;;  %v348_v3 = vunpack.c.l.b16 %v252_v59  ;;  %v391_v4 = vor.u32 %v390_v54, %v386_v53  ;;  %v2195_v59 = vld [vmem:[%s2845_s1 + $0x158] sm:$0xff] }
  0x2c   : > { %1343 = vmatmul.bf16.vlgmr.msra.gmra.mxu1 %v839_v62  ;;  %1333 = vmatmul.bf16.vlgmr.msra.gmra.mxu0 %v821_v63  ;;  %v2185_v62 = vld [vmem:[%s2845_s1 + $0x108] sm:$0xff]  ;;  %v2202_v63 = vld [vmem:[%s2845_s1 + $0x190] sm:$0xff] }
  0x2d   : > { %1354 = vmatpush.bf16.msrb.mxu1 %v2167_v58  ;;  %1441 = vmatpush.bf16.msrb.mxu0 %v2191_v60  ;;  %v397_v58 = vrot.slane %v395_v51, 1  ;;  %v2161_v60 = vld [vmem:[%s2845_s1 + $0x48] sm:$0xff]  ;;  %v2196_v51 = vld [vmem:[%s2845_s1 + $0x160] sm:$0xff] }
  0x2e   : > { %1499 = vmatpush.bf16.msrb.mxu2 %v2207_v61  ;;  %1420 = vmatmul.bf16.vlgmr.msra.gmra.mxu3 %v824_v10  ;;  %v2212_v61 = vld [vmem:[%s2845_s1 + $0x1e0] sm:$0xff]  ;;  %v1803_v10 = vld [vmem:[%s2384_s10 + $0x48] sm:$0xf] }
  0x2f   : > { %1391 = vmatmul.bf16.vlgmr.msra.gmra.mxu2 %v823_v2  ;;  %1528 = vmatpush.bf16.msrb.mxu3 %v2215_v7  ;;  %v346_v2 = vunpack.c.l.b16 %v251_v45  ;;  %v398_v5 = vor.u32 %v397_v58, %v393_v55  ;;  %v1769_v7 = vld [vmem:[%s2384_s10 + $0x94] sm:$0x1]  ;;  %v1804_v26 = vor.u32 %v2140_v13, %v1803_v10  ;;  %v2220_v45 = vld [vmem:[%s2845_s1 + $0x220] sm:$0xff] }
  0x30   : > { %v430_v23 = vunpack.c.l.b16 %v1769_v7 }
  0x31   : > { %1355 = vmatpush.bf16.msrb.mxu1 %v2166_v6  ;;  %1442 = vmatpush.bf16.msrb.mxu0 %v2190_v8  ;;  %v2211_v6 = vld [vmem:[%s2845_s1 + $0x1d8] sm:$0xff]  ;;  %v355_v16 = vpack.c.b16 %v346_v2, %v345_v32 }
  0x32   : > { %1500 = vmatpush.bf16.msrb.mxu2 %v2206_v9  ;;  %v1770_v8 = vld [vmem:[%s2384_s10 + $0x9c] sm:$0x1]  ;;  %v2160_v9 = vld [vmem:[%s2845_s1 + $0x40] sm:$0xff]  ;;  %v445_v36 = vpack.c.b16 %v430_v23, %v429_v0 }
  0x33   : > { %1529 = vmatpush.bf16.msrb.mxu3 %v2214_v20  ;;  %v660_v20 = vunpack.c.l.b16 %v398_v5  ;;  %v432_v24 = vunpack.c.l.b16 %v1770_v8  ;;  %v402_v32 = vshll.u32 %v355_v16, 16  ;;  %v400_v0 = vshrl.u32 %v355_v16, 16  ;;  %v2675_v5 = vld [vmem:[%s2384_s10 + $0xc8] sm:$0xf]  ;;  %v2208_v16 = vld [vmem:[%s2845_s1 + $0x1c0] sm:$0xff] }
  0x34   : > { %v454_v53 = vshrl.u32 %v445_v36, 16  ;;  %v443_v10 = vunpack.c.l.b16 %v2675_v5 }
  0x35   : > { %1356 = vmatpush.bf16.msrb.mxu1 %v2165_v17  ;;  %1443 = vmatpush.bf16.msrb.mxu0 %v2189_v18  ;;  %v356_v17 = vpack.c.b16 %v348_v3, %v347_v33  ;;  %v2144_v18 = vld [vmem:[%s2384_s10 + $0xdc] sm:$0xf0]  ;;  %v446_v37 = vpack.c.b16 %v432_v24, %v431_v1  ;;  %v404_v57 = vrot.slane %v402_v32, 1  ;;  %v2218_v24 = vld [vmem:[%s2845_s1 + $0x210] sm:$0xff]  ;;  %v1827_v32 = vld [vmem:[%s2384_s10 + $0x68] sm:$0xf] }
  0x36   : > { %1501 = vmatpush.bf16.msrb.mxu2 %v2205_v19  ;;  %v654_v19 = vunpack.c.l.b16 %v391_v4  ;;  %v2672_v4 = vld [vmem:[%s2384_s10 + $0xc0] sm:$0xf] }
  0x37   : > { %1530 = vmatpush.bf16.msrb.mxu3 %v2213_v29  ;;  %v437_v29 = vunpack.c.l.b16 %v2619_v21  ;;  %v409_v33 = vshll.u32 %v356_v17, 16  ;;  %v407_v1 = vshrl.u32 %v356_v17, 16  ;;  %v463_v50 = vshll.u32 %v446_v37, 16 }
  0x38   : > { %v461_v55 = vshrl.u32 %v446_v37, 16  ;;  %v2146_v37 = vld [vmem:[%s2384_s10 + $0xfc] sm:$0xf0] }
  0x39   : > { %1357 = vmatpush.bf16.msrb.mxu1 %v2164_v27  ;;  %1444 = vmatpush.bf16.msrb.mxu0 %v2188_v30  ;;  %v1808_v27 = vor.u32 %v2144_v18, %v1807_v14  ;;  %v439_v30 = vunpack.c.l.b16 %v2622_v22  ;;  %v465_v58 = vrot.slane %v463_v50, 1 }
  0x3a   : > { %1502 = vmatpush.bf16.msrb.mxu2 %v2204_v31  ;;  %v841_v31 = vpack.c.b16 %v660_v20, %v654_v19  ;;  %v2219_v19 = vld [vmem:[%s2845_s1 + $0x218] sm:$0xff]  ;;  %v2192_v20 = vld [vmem:[%s2845_s1 + $0x140] sm:$0xff] }
  0x3b   : > { %1531 = vmatpush.bf16.msrb.mxu3 %v2212_v61  ;;  %v842_v56 = vpack.c.b16 %v439_v30, %v437_v29  ;;  %v2141_v61 = vld [vmem:[%s2384_s10 + $0x5c] sm:$0xf0] }
  0x3c   : > { %1348 = vmatmul.bf16.gmra.mxu1 %v848_v42  ;;  %1338 = vmatmul.bf16.gmra.mxu0 %v830_v46  ;;  %v2200_v42 = vld [vmem:[%s2845_s1 + $0x180] sm:$0xff]  ;;  %v2210_v46 = vld [vmem:[%s2845_s1 + $0x1d0] sm:$0xff] }
  0x3d   : > { %1358 = vmatpush.bf16.msrb.mxu1 %v2163_v44  ;;  %1445 = vmatpush.bf16.msrb.mxu0 %v2187_v41  ;;  %v2201_v44 = vld [vmem:[%s2845_s1 + $0x188] sm:$0xff]  ;;  %v411_v41 = vrot.slane %v409_v33, 1 }
  0x3e   : > { %1503 = vmatpush.bf16.msrb.mxu2 %v2203_v38  ;;  %1425 = vmatmul.bf16.gmra.mxu3 %v833_v35  ;;  %v2209_v38 = vld [vmem:[%s2845_s1 + $0x1c8] sm:$0xff] }
  0x3f   : > { %1396 = vmatmul.bf16.gmra.mxu2 %v832_v49  ;;  %1532 = vmatpush.bf16.msrb.mxu3 %v2211_v6  ;;  %v456_v49 = vshll.u32 %v445_v36, 16  ;;  %v412_v35 = vor.u32 %v411_v41, %v407_v1  ;;  %v2194_v6 = vld [vmem:[%s2845_s1 + $0x150] sm:$0xff]  ;;  %v2217_v33 = vld [vmem:[%s2845_s1 + $0x208] sm:$0xff]  ;;  %v1831_v36 = vld [vmem:[%s2384_s10 + $0xf8] sm:$0xf] }
  0x40   : > { %v1832_v1 = vor.u32 %v2146_v37, %v1831_v36  ;;  %v1795_v36 = vld [vmem:[%s2384_s10 + $0x1c] sm:$0x1]  ;;  %v1796_v37 = vld [vmem:[%s2384_s10 + $0x24] sm:$0x1] }
  0x41   : > { %1359 = vmatpush.bf16.msrb.mxu1 %v2162_v52  ;;  %1446 = vmatpush.bf16.msrb.mxu0 %v2186_v28  ;;  %v2221_v52 = vld [vmem:[%s2845_s1 + $0x228] sm:$0xff]  ;;  %v405_v28 = vor.u32 %v404_v57, %v400_v0  ;;  %v458_v54 = vrot.slane %v456_v49, 1  ;;  %v672_v3 = vunpack.c.l.b16 %v412_v35  ;;  %v1794_v35 = vld [vmem:[%s2384_s10 + $0x14] sm:$0x1] }
  0x42   : > { %1504 = vmatpush.bf16.msrb.mxu2 %v2202_v63  ;;  %v2145_v63 = vld [vmem:[%s2384_s10 + $0xec] sm:$0xf0] }
  0x43   : > { %1533 = vmatpush.bf16.msrb.mxu3 %v2210_v46  ;;  %v666_v2 = vunpack.c.l.b16 %v405_v28  ;;  %v2148_v46 = vld [vmem:[%s2384_s10 + $0x54] sm:$0xf0]  ;;  %v2216_v28 = vld [vmem:[%s2845_s1 + $0x200] sm:$0xff] }
  0x45   : > { %1360 = vmatpush.bf16.msrb.mxu1 %v2161_v60  ;;  %1447 = vmatpush.bf16.msrb.mxu0 %v2185_v62  ;;  %v1815_v60 = vld [vmem:[%s2384_s10 + $0x58] sm:$0xf]  ;;  %v1819_v62 = vld [vmem:[%s2384_s10 + $0xe8] sm:$0xf]  ;;  %v850_v13 = vpack.c.b16 %v672_v3, %v666_v2  ;;  %v2143_v2 = vld [vmem:[%s2384_s10 + $0x7c] sm:$0xf0] }
  0x46   : > { %1505 = vmatpush.bf16.msrb.mxu2 %v2201_v44  ;;  %v1816_v7 = vor.u32 %v2141_v61, %v1815_v60  ;;  %v1820_v8 = vor.u32 %v2145_v63, %v1819_v62  ;;  %v1839_v62 = vld [vmem:[%s2384_s10 + $0x78] sm:$0xf]  ;;  %v1843_v3 = vld [vmem:[%s2384_s10 + $0x108] sm:$0xf] }
  0x47   : > { %1534 = vmatpush.bf16.msrb.mxu3 %v2209_v38 }
  0x49   : > { %1361 = vmatpush.bf16.msrb.mxu1 %v2160_v9  ;;  %1448 = vmatpush.bf16.msrb.mxu0 %v2184_v12  ;;  %v441_v9 = vunpack.c.l.b16 %v2672_v4  ;;  %v466_v12 = vor.u32 %v465_v58, %v461_v55  ;;  %v1780_v55 = vld [vmem:[%s2384_s10 + $0x20] sm:$0xf] }
  0x4a   : > { %1506 = vmatpush.bf16.msrb.mxu2 %v2200_v42  ;;  %v1811_v42 = vld [vmem:[%s2384_s10 + $0x50] sm:$0xf] }
  0x4b   : > { %v851_v14 = vpack.c.b16 %v443_v10, %v441_v9  ;;  %v638_v18 = vunpack.c.l.b16 %v466_v12  ;;  %1535 = vmatpush.bf16.msrb.mxu3 %v2208_v16 }
  0x4c   : > { %1362 = vmatmul.bf16.vlgmr.msrb.gmra.mxu1 %v1804_v26  ;;  %1449 = vmatmul.bf16.vlgmr.msrb.gmra.mxu0 %v1808_v27  ;;  %v1778_v26 = vld [vmem:[%s2384_s10 + $0x10] sm:$0xf]  ;;  %v1771_v27 = vld [vmem:[%s2384_s10 + $0xa4] sm:$0x1] }
  0x4d   : > { %1470 = vmatpush.bf16.msra.mxu1 %v2199_v11  ;;  %1557 = vmatpush.bf16.msra.mxu0 %v2223_v15  ;;  %v459_v11 = vor.u32 %v458_v54, %v454_v53  ;;  %v527_v44 = vunpack.c.l.b16 %v1778_v26  ;;  %v1779_v54 = vld [vmem:[%s2384_s10 + $0x18] sm:$0xf] }
  0x4e   : > { %1430 = vmatmul.bf16.gmra.mxu3 %v842_v56  ;;  %2255 = vmatpush.bf16.msra.mxu2 %v2223_v15  ;;  %v2193_v15 = vld [vmem:[%s2845_s1 + $0x148] sm:$0xff]  ;;  %v434_v56 = vunpack.c.l.b16 %v1771_v27 }
  0x4f   : > { %1401 = vmatmul.bf16.gmra.mxu2 %v841_v31  ;;  %v632_v17 = vunpack.c.l.b16 %v459_v11  ;;  %v1772_v31 = vld [vmem:[%s2384_s10 + $0xac] sm:$0x1] }
  0x50   : > { %v436_v0 = vunpack.c.l.b16 %v1772_v31  ;;  %v447_v49 = vpack.c.b16 %v434_v56, %v433_v47 }
  0x51   : > { %1471 = vmatpush.bf16.msra.mxu1 %v2198_v25  ;;  %1558 = vmatpush.bf16.msra.mxu0 %v2222_v34  ;;  %v2698_v23 = vpack.c.b16 %v638_v18, %v632_v17  ;;  %v1777_v25 = vld [vmem:[%s2384_s10 + $0x8] sm:$0xf]  ;;  %v1840_v17 = vor.u32 %v2143_v2, %v1839_v62 }
  0x52   : > { %2256 = vmatpush.bf16.msra.mxu2 %v2222_v34  ;;  %v2142_v34 = vld [vmem:[%s2384_s10 + $0x6c] sm:$0xf0]  ;;  %v448_v50 = vpack.c.b16 %v436_v0, %v435_v48  ;;  %v468_v47 = vshrl.u32 %v447_v49, 16  ;;  %v470_v43 = vshll.u32 %v447_v49, 16  ;;  %v528_v48 = vunpack.c.l.b16 %v1794_v35 }
  0x53   : > { %v1828_v57 = vor.u32 %v2142_v34, %v1827_v32  ;;  %v530_v0 = vunpack.c.l.b16 %v1795_v36 }
  0x54   : > { %v475_v38 = vshrl.u32 %v448_v50, 16  ;;  %v472_v53 = vrot.slane %v470_v43, 1  ;;  %v542_v61 = vpack.c.b16 %v528_v48, %v527_v44  ;;  %v1775_v48 = vld [vmem:[%s2384_s10 + $0xc4] sm:$0x1] }
  0x55   : > { %1472 = vmatpush.bf16.msra.mxu1 %v2197_v39  ;;  %1559 = vmatpush.bf16.msra.mxu0 %v2221_v52  ;;  %v525_v39 = vunpack.c.l.b16 %v1777_v25  ;;  %v2149_v25 = vld [vmem:[%s2384_s10 + $0x64] sm:$0xf0] }
  0x56   : > { %2257 = vmatpush.bf16.msra.mxu2 %v2221_v52  ;;  %v1812_v52 = vor.u32 %v2148_v46, %v1811_v42  ;;  %v473_v60 = vor.u32 %v472_v53, %v468_v47  ;;  %v559_v16 = vshll.u32 %v542_v61, 16  ;;  %v1781_v42 = vld [vmem:[%s2384_s10 + $0x28] sm:$0xf]  ;;  %v1782_v46 = vld [vmem:[%s2384_s10 + $0x30] sm:$0xf] }
  0x57   : > { %v827_v41 = vpack.c.b16 %v527_v44, %v525_v39 }
  0x58   : > { %v644_v11 = vunpack.c.l.b16 %v473_v60  ;;  %v561_v34 = vrot.slane %v559_v16, 1  ;;  %v1835_v60 = vld [vmem:[%s2384_s10 + $0x70] sm:$0xf] }
  0x59   : > { %1473 = vmatpush.bf16.msra.mxu1 %v2196_v51  ;;  %1560 = vmatpush.bf16.msra.mxu0 %v2220_v45  ;;  %v1793_v51 = vld [vmem:[%s2384_s10 + $0xc] sm:$0x1] }
  0x5a   : > { %2258 = vmatpush.bf16.msra.mxu2 %v2220_v45  ;;  %v526_v40 = vunpack.c.l.b16 %v1793_v51  ;;  %v477_v45 = vshll.u32 %v448_v50, 16 }
  0x5c   : > { %1367 = vmatmul.bf16.gmra.mxu1 %v1816_v7  ;;  %1454 = vmatmul.bf16.gmra.mxu0 %v1820_v8  ;;  %v479_v58 = vrot.slane %v477_v45, 1  ;;  %v529_v7 = vunpack.c.l.b16 %v1779_v54  ;;  %v531_v8 = vunpack.c.l.b16 %v1780_v55 }
  0x5d   : > { %1474 = vmatpush.bf16.msra.mxu1 %v2195_v59  ;;  %1561 = vmatpush.bf16.msra.mxu0 %v2219_v19  ;;  %v541_v59 = vpack.c.b16 %v526_v40, %v525_v39  ;;  %v535_v40 = vunpack.c.l.b16 %v1782_v46 }
  0x5e   : > { %1435 = vmatmul.bf16.gmra.mxu3 %v851_v14  ;;  %2259 = vmatpush.bf16.msra.mxu2 %v2219_v19  ;;  %v480_v63 = vor.u32 %v479_v58, %v475_v38  ;;  %v1774_v14 = vld [vmem:[%s2384_s10 + $0xbc] sm:$0x1]  ;;  %v543_v51 = vpack.c.b16 %v530_v0, %v529_v7  ;;  %v1776_v38 = vld [vmem:[%s2384_s10 + $0xcc] sm:$0x1] }
  0x5f   : > { %1406 = vmatmul.bf16.gmra.mxu2 %v850_v13  ;;  %v1773_v13 = vld [vmem:[%s2384_s10 + $0xb4] sm:$0x1]  ;;  %v440_v27 = vunpack.c.l.b16 %v1774_v14  ;;  %v550_v31 = vshrl.u32 %v541_v59, 16  ;;  %v444_v2 = vunpack.c.l.b16 %v1776_v38 }
  0x60   : > { %v650_v12 = vunpack.c.l.b16 %v480_v63  ;;  %v438_v26 = vunpack.c.l.b16 %v1773_v13  ;;  %v566_v45 = vshll.u32 %v543_v51, 16  ;;  %v442_v63 = vunpack.c.l.b16 %v1775_v48 }
  0x61   : > { %1475 = vmatpush.bf16.msra.mxu1 %v2194_v6  ;;  %1562 = vmatpush.bf16.msra.mxu0 %v2218_v24  ;;  %v2147_v6 = vld [vmem:[%s2384_s10 + $0x10c] sm:$0xf0]  ;;  %v450_v56 = vpack.c.b16 %v440_v27, %v439_v30  ;;  %v533_v30 = vunpack.c.l.b16 %v1781_v42  ;;  %v452_v16 = vpack.c.b16 %v444_v2, %v443_v10  ;;  %v1783_v27 = vld [vmem:[%s2384_s10 + $0x38] sm:$0xf] }
  0x62   : > { %2260 = vmatpush.bf16.msra.mxu2 %v2218_v24  ;;  %v1844_v18 = vor.u32 %v2147_v6, %v1843_v3  ;;  %v2733_v19 = vpack.c.b16 %v650_v12, %v644_v11  ;;  %v1823_v24 = vld [vmem:[%s2384_s10 + $0x60] sm:$0xf]  ;;  %v449_v44 = vpack.c.b16 %v438_v26, %v437_v29  ;;  %v1797_v3 = vld [vmem:[%s2384_s10 + $0x2c] sm:$0x1]  ;;  %v564_v6 = vshrl.u32 %v543_v51, 16 }
  0x63   : > { %v1824_v39 = vor.u32 %v2149_v25, %v1823_v24  ;;  %v491_v50 = vshll.u32 %v450_v56, 16  ;;  %v489_v29 = vshrl.u32 %v450_v56, 16  ;;  %v1800_v24 = vld [vmem:[%s2384_s10 + $0x44] sm:$0x1]  ;;  %v503_v56 = vshrl.u32 %v452_v16, 16 }
  0x64   : > { %v484_v49 = vshll.u32 %v449_v44, 16  ;;  %v482_v21 = vshrl.u32 %v449_v44, 16 }
  0x65   : > { %1476 = vmatpush.bf16.msra.mxu1 %v2193_v15  ;;  %1563 = vmatpush.bf16.msra.mxu0 %v2217_v33  ;;  %v552_v15 = vshll.u32 %v541_v59, 16  ;;  %v493_v47 = vrot.slane %v491_v50, 1  ;;  %v845_v59 = vpack.c.b16 %v535_v40, %v533_v30 }
  0x66   : > { %2261 = vmatpush.bf16.msra.mxu2 %v2217_v33  ;;  %v557_v33 = vshrl.u32 %v542_v61, 16  ;;  %v486_v22 = vrot.slane %v484_v49, 1  ;;  %v2150_v61 = vld [vmem:[%s2384_s10 + $0x74] sm:$0xf0] }
  0x67   : > { %v554_v32 = vrot.slane %v552_v15, 1  ;;  %v494_v54 = vor.u32 %v493_v47, %v489_v29  ;;  %v1836_v14 = vor.u32 %v2150_v61, %v1835_v60  ;;  %v451_v15 = vpack.c.b16 %v442_v63, %v441_v9  ;;  %v2151_v29 = vld [vmem:[%s2384_s10 + $0x84] sm:$0xf0] }
  0x68   : > { %v487_v43 = vor.u32 %v486_v22, %v482_v21  ;;  %v1847_v22 = vld [vmem:[%s2384_s10 + $0x80] sm:$0xf] }
  0x69   : > { %1477 = vmatpush.bf16.msra.mxu1 %v2192_v20  ;;  %1564 = vmatpush.bf16.msra.mxu0 %v2216_v28  ;;  %v836_v20 = vpack.c.b16 %v531_v8, %v529_v7  ;;  %v662_v62 = vunpack.c.l.b16 %v494_v54  ;;  %v1798_v7 = vld [vmem:[%s2384_s10 + $0x34] sm:$0x1]  ;;  %v498_v36 = vshll.u32 %v451_v15, 16  ;;  %v496_v10 = vshrl.u32 %v451_v15, 16 }
  0x6a   : > { %2262 = vmatpush.bf16.msra.mxu2 %v2216_v28  ;;  %v656_v58 = vunpack.c.l.b16 %v487_v43  ;;  %v1848_v47 = vor.u32 %v2151_v29, %v1847_v22 }
  0x6b   : > { %v500_v44 = vrot.slane %v498_v36, 1 }
  0x6c   : > { %1372 = vmatmul.bf16.gmra.mxu1 %v1828_v57  ;;  %1459 = vmatmul.bf16.gmra.mxu0 %v1832_v1  ;;  %v532_v57 = vunpack.c.l.b16 %v1796_v37  ;;  %v555_v1 = vor.u32 %v554_v32, %v550_v31  ;;  %v2751_v13 = vpack.c.b16 %v662_v62, %v656_v58  ;;  %v1784_v31 = vld [vmem:[%s2384_s10 + $0x40] sm:$0xf]  ;;  %v505_v37 = vshll.u32 %v452_v16, 16 }
  0x6d   : > { %v539_v5 = vunpack.c.l.b16 %v1784_v31 }
  0x6e   : > { %1536 = vmatmul.bf16.vlgmr.msrb.gmra.mxu3 %v1812_v52  ;;  %v544_v52 = vpack.c.b16 %v532_v57, %v531_v8  ;;  %v634_v28 = vunpack.c.l.b16 %v555_v1  ;;  %v568_v8 = vrot.slane %v566_v45, 1  ;;  %v507_v0 = vrot.slane %v505_v37, 1 }
  0x6f   : > { %1507 = vmatmul.bf16.vlgmr.msrb.gmra.mxu2 %v827_v41  ;;  %v562_v41 = vor.u32 %v561_v34, %v557_v33 }
  0x70   : > { %v573_v53 = vshll.u32 %v544_v52, 16  ;;  %v571_v11 = vshrl.u32 %v544_v52, 16  ;;  %v569_v25 = vor.u32 %v568_v8, %v564_v6  ;;  %v508_v42 = vor.u32 %v507_v0, %v503_v56 }
  0x71   : > { %v640_v35 = vunpack.c.l.b16 %v562_v41  ;;  %v501_v41 = vor.u32 %v500_v44, %v496_v10 }
  0x72   : > { %v575_v12 = vrot.slane %v573_v53, 1  ;;  %v646_v4 = vunpack.c.l.b16 %v569_v25  ;;  %v674_v52 = vunpack.c.l.b16 %v508_v42 }
  0x73   : > { %v829_v55 = vpack.c.b16 %v640_v35, %v634_v28  ;;  %v668_v51 = vunpack.c.l.b16 %v501_v41 }
  0x74   : > { %v576_v26 = vor.u32 %v575_v12, %v571_v11 }
  0x76   : > { %v652_v9 = vunpack.c.l.b16 %v576_v26 }
  0x78   : > { %v838_v46 = vpack.c.b16 %v652_v9, %v646_v4 }
  0x7c   : > { %1377 = vmatmul.bf16.gmra.mxu1 %v1840_v17  ;;  %1464 = vmatmul.bf16.gmra.mxu0 %v1844_v18  ;;  %v534_v17 = vunpack.c.l.b16 %v1797_v3  ;;  %v536_v18 = vunpack.c.l.b16 %v1798_v7 }
  0x7e   : > { %1541 = vmatmul.bf16.gmra.mxu3 %v1824_v39  ;;  %v545_v33 = vpack.c.b16 %v534_v17, %v533_v30  ;;  %v546_v34 = vpack.c.b16 %v536_v18, %v535_v40  ;;  %v537_v39 = vunpack.c.l.b16 %v1783_v27  ;;  %v853_v30 = vpack.c.b16 %v674_v52, %v668_v51 }
  0x7f   : > { %1512 = vmatmul.bf16.gmra.mxu2 %v836_v20  ;;  %v1799_v20 = vld [vmem:[%s2384_s10 + $0x3c] sm:$0x1] }
  0x80   : > { %v538_v32 = vunpack.c.l.b16 %v1799_v20  ;;  %v580_v49 = vshll.u32 %v545_v33, 16  ;;  %v587_v50 = vshll.u32 %v546_v34, 16  ;;  %v854_v21 = vpack.c.b16 %v539_v5, %v537_v39 }
  0x81   : > { %v578_v40 = vshrl.u32 %v545_v33, 16  ;;  %v585_v48 = vshrl.u32 %v546_v34, 16 }
  0x82   : > { %v547_v57 = vpack.c.b16 %v538_v32, %v537_v39  ;;  %v582_v43 = vrot.slane %v580_v49, 1  ;;  %v589_v38 = vrot.slane %v587_v50, 1 }
  0x84   : > { %v594_v28 = vshll.u32 %v547_v57, 16  ;;  %v592_v45 = vshrl.u32 %v547_v57, 16  ;;  %v583_v58 = vor.u32 %v582_v43, %v578_v40 }
  0x86   : > { %v596_v53 = vrot.slane %v594_v28, 1  ;;  %v658_v62 = vunpack.c.l.b16 %v583_v58 }
  0x88   : > { %v597_v60 = vor.u32 %v596_v53, %v592_v45 }
  0x8a   : > { %v670_v2 = vunpack.c.l.b16 %v597_v60 }
  0x8c   : > { %1478 = vmatmul.bf16.vlgmr.msra.gmra.mxu1 %v2698_v23  ;;  %1565 = vmatmul.bf16.vlgmr.msra.gmra.mxu0 %v829_v55  ;;  %v540_v23 = vunpack.c.l.b16 %v1800_v24 }
  0x8e   : > { %1546 = vmatmul.bf16.gmra.mxu3 %v1836_v14  ;;  %v548_v1 = vpack.c.b16 %v540_v23, %v539_v5 }
  0x8f   : > { %1517 = vmatmul.bf16.gmra.mxu2 %v845_v59  ;;  %v590_v59 = vor.u32 %v589_v38, %v585_v48 }
  0x90   : > { %v601_v35 = vshll.u32 %v548_v1, 16  ;;  %v599_v54 = vshrl.u32 %v548_v1, 16 }
  0x91   : > { %v664_v63 = vunpack.c.l.b16 %v590_v59 }
  0x92   : > { %v603_v55 = vrot.slane %v601_v35, 1 }
  0x94   : > { %v604_v61 = vor.u32 %v603_v55, %v599_v54 }
  0x96   : > { %v676_v3 = vunpack.c.l.b16 %v604_v61 }
  0x98   : > { %v856_v8 = vpack.c.b16 %v676_v3, %v670_v2 }
  0x9c   : > { %1483 = vmatmul.bf16.gmra.mxu1 %v2733_v19  ;;  %1570 = vmatmul.bf16.gmra.mxu0 %v838_v46  ;;  %v847_v19 = vpack.c.b16 %v664_v63, %v658_v62 }
  0x9e   : > { %1551 = vmatmul.bf16.gmra.mxu3 %v1848_v47 }
  0x9f   : > { %1522 = vmatmul.bf16.gmra.mxu2 %v854_v21 }
  0xa9   : > { %v1344_v6 = vpop.f32.mrf.mxu1  ;;  %v1334_v7 = vpop.f32.mrf.mxu0 }
  0xac   : > { %1488 = vmatmul.bf16.gmra.mxu1 %v2751_v13  ;;  %1575 = vmatmul.bf16.gmra.mxu0 %v847_v19 }
  0xaf   : > { %1580 = vmatmul.bf16.vlgmr.msra.gmra.mxu2 %v856_v8 }
  0xb1   : > { %v1346_v12 = vpop.f32.mrf.mxu1  ;;  %v1336_v14 = vpop.f32.mrf.mxu0 }
  0xb2   : > { %v1392_v11 = vpop.f32.mrf.mxu2  ;;  %v1421_v15 = vpop.f32.mrf.mxu3 }
  0xb9   : > { %v1349_v17 = vpop.f32.mrf.mxu1  ;;  %v1339_v18 = vpop.f32.mrf.mxu0 }
  0xba   : > { %v1394_v16 = vpop.f32.mrf.mxu2  ;;  %v2766_v20 = vpop.f32.mrf.mxu3 }
  0xbc   : > { %1493 = vmatmul.bf16.gmra.mxu1 %v853_v30 }
  0xc1   : > { %v1351_v25 = vpop.f32.mrf.mxu1  ;;  %v1341_v26 = vpop.f32.mrf.mxu0 }
  0xc2   : > { %v1397_v24 = vpop.f32.mrf.mxu2  ;;  %v1426_v27 = vpop.f32.mrf.mxu3 }
  0xc9   : > { %v1363_v32 = vpop.f32.mrf.mxu1  ;;  %v1450_v23 = vpop.f32.mrf.mxu0 }
  0xca   : > { %v1399_v31 = vpop.f32.mrf.mxu2  ;;  %v1364_v13 = vadd.f32 %v1363_v32, %v1334_v7  ;;  %v2768_v34 = vpop.f32.mrf.mxu3 }
  0xcc   : > { %v1393_v33 = vadd.f32 %v1392_v11, %v1364_v13 }
  0xce   : > { %v1422_v36 = vadd.f32 %v1421_v15, %v1393_v33 }
  0xd0   : > { %v1451_v37 = vadd.f32 %v1450_v23, %v1422_v36 }
  0xd1   : > { %v1365_v9 = vpop.f32.mrf.mxu1  ;;  %v1452_v39 = vpop.f32.mrf.mxu0 }
  0xd2   : > { %v1402_v4 = vpop.f32.mrf.mxu2  ;;  %v1366_v5 = vadd.f32 %v1365_v9, %v1336_v14  ;;  %v1431_v44 = vpop.f32.mrf.mxu3 }
  0xd4   : > { %v1395_v10 = vadd.f32 %v1394_v16, %v1366_v5 }
  0xd9   : > { %v1368_v0 = vpop.f32.mrf.mxu1  ;;  %v1455_v57 = vpop.f32.mrf.mxu0 }
  0xda   : > { %v1404_v56 = vpop.f32.mrf.mxu2  ;;  %v1369_v1 = vadd.f32 %v1368_v0, %v1339_v18  ;;  %v2770_v50 = vpop.f32.mrf.mxu3 }
  0xdc   : > { %v1398_v41 = vadd.f32 %v1397_v24, %v1369_v1 }
  0xde   : > { %v1427_v42 = vadd.f32 %v1426_v27, %v1398_v41 }
  0xe0   : > { %v1456_v46 = vadd.f32 %v1455_v57, %v1427_v42 }
  0xe1   : > { %v1370_v51 = vpop.f32.mrf.mxu1  ;;  %v2772_v52 = vpop.f32.mrf.mxu0 }
  0xe2   : > { %v1407_v49 = vpop.f32.mrf.mxu2  ;;  %v1371_v28 = vadd.f32 %v1370_v51, %v1341_v26  ;;  %v1436_v40 = vpop.f32.mrf.mxu3  ;;  %v1424_v26 = vadd.f32 %v2766_v20, %v1395_v10  ;;  %v2798_v20 = vld [vmem:[%s2847_s3] ss:$0 sm:$0xff] }
  0xe4   : > { %v1400_v35 = vadd.f32 %v1399_v31, %v1371_v28  ;;  %v1453_v31 = vadd.f32 %v1452_v39, %v1424_v26 }
  0xe6   : > { %v1429_v1 = vadd.f32 %v2768_v34, %v1400_v35 }
  0xe9   : > { %v1373_v22 = vpop.f32.mrf.mxu1  ;;  %v1460_v29 = vpop.f32.mrf.mxu0 }
  0xea   : > { %v1409_v21 = vpop.f32.mrf.mxu2  ;;  %v1374_v30 = vadd.f32 %v1373_v22, %v1344_v6  ;;  %v2780_v58 = vpop.f32.mrf.mxu3 }
  0xec   : > { %v1403_v47 = vadd.f32 %v1402_v4, %v1374_v30 }
  0xee   : > { %v1432_v43 = vadd.f32 %v1431_v44, %v1403_v47 }
  0xf0   : > { %v2774_v48 = vadd.f32 %v1460_v29, %v1432_v43  ;;  %v1458_v29 = vadd.f32 %v2772_v52, %v1429_v1 }
  0xf1   : > { %v1375_v45 = vpop.f32.mrf.mxu1  ;;  %v2776_v53 = vpop.f32.mrf.mxu0 }
  0xf2   : > { %v1508_v38 = vpop.f32.mrf.mxu2  ;;  %v1376_v54 = vadd.f32 %v1375_v45, %v1346_v12  ;;  %v1537_v3 = vpop.f32.mrf.mxu3 }
  0xf4   : > { %v2778_v55 = vadd.f32 %v1404_v56, %v1376_v54 }
  0xf9   : > { %v1378_v60 = vpop.f32.mrf.mxu1  ;;  %v1465_v61 = vpop.f32.mrf.mxu0 }
  0xfa   : > { %v1510_v59 = vpop.f32.mrf.mxu2  ;;  %v1379_v62 = vadd.f32 %v1378_v60, %v1349_v17  ;;  %v1539_v12 = vpop.f32.mrf.mxu3 }
  0xfc   : > { %v1408_v63 = vadd.f32 %v1407_v49, %v1379_v62 }
  0xfe   : > { %v1437_v2 = vadd.f32 %v1436_v40, %v1408_v63 }
 0x100   : > { %v2782_v19 = vadd.f32 %v1465_v61, %v1437_v2  ;;  %v1434_v2 = vadd.f32 %v2770_v50, %v2778_v55 }
 0x101   : > { %v1380_v7 = vpop.f32.mrf.mxu1  ;;  %v2784_v8 = vpop.f32.mrf.mxu0 }
 0x102   : > { %v1513_v6 = vpop.f32.mrf.mxu2  ;;  %v1381_v11 = vadd.f32 %v1380_v7, %v1351_v25  ;;  %v2792_v25 = vld [vmem:[%s2846_s2] ss:$0 sm:$0xff]  ;;  %v1542_v36 = vpop.f32.mrf.mxu3 }
 0x104   : > { %v2786_v14 = vadd.f32 %v1409_v21, %v1381_v11 }
 0x109   : > { %v1479_v15 = vpop.f32.mrf.mxu1  ;;  %v1566_v16 = vpop.f32.mrf.mxu0 }
 0x10a   : > { %v1480_v18 = vadd.f32 %v1479_v15, %v1451_v37  ;;  %v1515_v24 = vpop.f32.mrf.mxu2  ;;  %v1544_v49 = vpop.f32.mrf.mxu3  ;;  %v1463_v15 = vadd.f32 %v2776_v53, %v1434_v2 }
 0x10c   : > { %v1509_v17 = vadd.f32 %v1508_v38, %v1480_v18 }
 0x10e   : > { %v1538_v27 = vadd.f32 %v1537_v3, %v1509_v17 }
 0x110   : > { %v1567_v13 = vadd.f32 %v1566_v16, %v1538_v27 }
 0x111   : > { %v1481_v32 = vpop.f32.mrf.mxu1  ;;  %v1568_v23 = vpop.f32.mrf.mxu0 }
 0x112   : > { %v1482_v33 = vadd.f32 %v1481_v32, %v1453_v31  ;;  %v1518_v9 = vpop.f32.mrf.mxu2  ;;  %v1590_v37 = vmul.f32 %v2792_v25, %v1567_v13  ;;  %v1547_v45 = vpop.f32.mrf.mxu3 }
 0x114   : > { %v1511_v4 = vadd.f32 %v1510_v59, %v1482_v33  ;;  %v1602_v56 = vadd.f32 %v2798_v20, %v1590_v37 }
 0x116   : > { %v1540_v39 = vadd.f32 %v1539_v12, %v1511_v4  ;;  %v1610_v51 = vmax.f32 %v1602_v56, 0.0  ;;  %v1439_v4 = vadd.f32 %v2780_v58, %v2786_v14 }
 0x118   : > { %v1569_v5 = vadd.f32 %v1568_v23, %v1540_v39  ;;  %v1468_v56 = vadd.f32 %v2784_v8, %v1439_v4 }
 0x119   : > { %v1484_v10 = vpop.f32.mrf.mxu1  ;;  %v1571_v44 = vpop.f32.mrf.mxu0 }
 0x11a   : > { %v1591_v0 = vmul.f32 %v2792_v25, %v1569_v5  ;;  %v1485_v57 = vadd.f32 %v1484_v10, %v1456_v46  ;;  %v1520_v22 = vpop.f32.mrf.mxu2  ;;  %v1549_v18 = vpop.f32.mrf.mxu3 }
 0x11c   : > { %v1603_v41 = vadd.f32 %v2798_v20, %v1591_v0  ;;  %v1514_v42 = vadd.f32 %v1513_v6, %v1485_v57 }
 0x11e   : > { %v1611_v28 = vmax.f32 %v1603_v41, 0.0  ;;  %v1543_v21 = vadd.f32 %v1542_v36, %v1514_v42 }
 0x120   : > { %v2227_v46 = vpack.c.bf16 %v1611_v28, %v1610_v51  ;;  %v1572_v35 = vadd.f32 %v1571_v44, %v1543_v21 }
 0x121   : > { %v1486_v30 = vpop.f32.mrf.mxu1  ;;  %v1573_v34 = vpop.f32.mrf.mxu0 }
 0x122   : > { %2228 = vst [vmem:[%s2808_s25] sm:$0xff] %v2227_v46   ;;  %v1487_v40 = vadd.f32 %v1486_v30, %v1458_v29  ;;  %v1592_v43 = vmul.f32 %v2792_v25, %v1572_v35  ;;  %v1523_v59 = vpop.f32.mrf.mxu2  ;;  %v1552_v36 = vpop.f32.mrf.mxu3 }
 0x124   : > { %v1516_v47 = vadd.f32 %v1515_v24, %v1487_v40  ;;  %v1604_v61 = vadd.f32 %v2798_v20, %v1592_v43 }
 0x126   : > { %v1545_v38 = vadd.f32 %v1544_v49, %v1516_v47  ;;  %v1612_v7 = vmax.f32 %v1604_v61, 0.0 }
 0x128   : > { %v1574_v54 = vadd.f32 %v1573_v34, %v1545_v38 }
 0x129   : > { %v1489_v60 = vpop.f32.mrf.mxu1  ;;  %v1576_v63 = vpop.f32.mrf.mxu0 }
 0x12a   : > { %v1593_v62 = vmul.f32 %v2792_v25, %v1574_v54  ;;  %v1490_v52 = vadd.f32 %v1489_v60, %v2774_v48  ;;  %v1525_v27 = vpop.f32.mrf.mxu2  ;;  %v1554_v42 = vpop.f32.mrf.mxu3 }
 0x12c   : > { %v1605_v3 = vadd.f32 %v2798_v20, %v1593_v62  ;;  %v1519_v6 = vadd.f32 %v1518_v9, %v1490_v52 }
 0x12e   : > { %v1613_v11 = vmax.f32 %v1605_v3, 0.0  ;;  %v1548_v12 = vadd.f32 %v1547_v45, %v1519_v6 }
 0x130   : > { %v2232_v16 = vpack.c.bf16 %v1613_v11, %v1612_v7  ;;  %v1577_v26 = vadd.f32 %v1576_v63, %v1548_v12 }
 0x131   : > { %v1491_v24 = vpop.f32.mrf.mxu1  ;;  %v1578_v31 = vpop.f32.mrf.mxu0 }
 0x132   : > { %2244 = vst [vmem:[%s2808_s25 + $0x8] sm:$0xff] %v2232_v16   ;;  %v1492_v17 = vadd.f32 %v1491_v24, %v1463_v15  ;;  %v1594_v32 = vmul.f32 %v2792_v25, %v1577_v26  ;;  %v1581_v39 = vpop.f32.mrf.mxu2 }
 0x134   : > { %v1521_v48 = vadd.f32 %v1520_v22, %v1492_v17  ;;  %v1606_v13 = vadd.f32 %v2798_v20, %v1594_v32 }
 0x136   : > { %v1550_v50 = vadd.f32 %v1549_v18, %v1521_v48  ;;  %v1614_v5 = vmax.f32 %v1606_v13, 0.0 }
 0x138   : > { %v1579_v55 = vadd.f32 %v1578_v31, %v1550_v50 }
 0x139   : > { %v1494_v23 = vpop.f32.mrf.mxu1 }
 0x13a   : > { %v1595_v33 = vmul.f32 %v2792_v25, %v1579_v55  ;;  %v1495_v53 = vadd.f32 %v1494_v23, %v2782_v19  ;;  %v1583_v14 = vpop.f32.mrf.mxu2 }
 0x13c   : > { %v1607_v9 = vadd.f32 %v2798_v20, %v1595_v33  ;;  %v1524_v37 = vadd.f32 %v1523_v59, %v1495_v53 }
 0x13e   : > { %v1615_v10 = vmax.f32 %v1607_v9, 0.0  ;;  %v1553_v44 = vadd.f32 %v1552_v36, %v1524_v37 }
 0x140   : > { %v2237_v0 = vpack.c.bf16 %v1615_v10, %v1614_v5  ;;  %v1582_v1 = vadd.f32 %v1581_v39, %v1553_v44 }
 0x141   : > { %v1496_v57 = vpop.f32.mrf.mxu1 }
 0x142   : > { %2245 = vst [vmem:[%s2808_s25 + $0x10] sm:$0xff] %v2237_v0   ;;  %v1497_v41 = vadd.f32 %v1496_v57, %v1468_v56  ;;  %v1596_v49 = vmul.f32 %v2792_v25, %v1582_v1 }
 0x144   : > { %v1526_v19 = vadd.f32 %v1525_v27, %v1497_v41  ;;  %v1608_v28 = vadd.f32 %v2798_v20, %v1596_v49 }
 0x146   : > { %v1555_v58 = vadd.f32 %v1554_v42, %v1526_v19  ;;  %v1616_v8 = vmax.f32 %v1608_v28, 0.0 }
 0x148   : > { %v1584_v51 = vadd.f32 %v1583_v14, %v1555_v58 }
 0x14a   : > { %v1597_v21 = vmul.f32 %v2792_v25, %v1584_v51 }
 0x14c   : > { %v1609_v22 = vadd.f32 %v2798_v20, %v1597_v21 }
 0x14e   : > { %v1617_v29 = vmax.f32 %v1609_v22, 0.0 }
 0x150   : > { %v2242_v46 = vpack.c.bf16 %v1617_v29, %v1616_v8 }
 0x152   : > { %2246 = vst [vmem:[%s2808_s25 + $0x18] sm:$0xff] %v2242_v46  }
 0x153 PF: > { %s14_s17 = sadd.s32 1, %s2312_s17   ;;  %s2849_s15 = smov %s2308_s16 }
 0x154   : > { %p11_p5 = scmp.ge.s32.totalorder %s14_s17, 4   ;;  %s2850_s16 = smov %s2852_s18 }
 0x156   :  { %13 = sbr.rel (!%p11_p5) target bundleno = 2 (0x2), region = 72 }

// kernel: bottleneck_forward.5
= control target key start
LH: loop header
LB: loop body
LE: loop exit
PB: predicated region body
PF: predicated region fallthrough
CT: control target
= control target key end

     0   :  { %s1007_s1 = inlined_call_operand.vmem [shape: bf16[128,128], index: 1, kind: input, shape index: {}]   ;;  %s1008_s5 = inlined_call_operand.vmem [shape: bf16[128,128], index: 5, kind: input, shape index: {}]   ;;  %s1009_s2 = inlined_call_operand.vmem [shape: f32[1,128], index: 2, kind: input, shape index: {}]   ;;  %s1010_s3 = inlined_call_operand.vmem [shape: f32[1,128], index: 3, kind: input, shape index: {}]   ;;  %s1011_s0 = inlined_call_operand.vmem [shape: bf16[128,128], index: 0, kind: input, shape index: {}]   ;;  %s1012_s4 = inlined_call_operand.vmem [shape: bf16[128,128], index: 4, kind: input, shape index: {}]   ;;  %s1013_s6 = inlined_call_operand.vmem [shape: f32[1,128], index: 6, kind: input, shape index: {}]   ;;  %s1014_s7 = inlined_call_operand.vmem [shape: f32[1,128], index: 7, kind: input, shape index: {}]   ;;  %s1015_s8 = inlined_call_operand.vmem [shape: bf16[128,128], index: 8, kind: output, shape index: {}]  }
   0x1   :  { %v674_v0 = vld [vmem:[%s1007_s1 + $0x38] sm:$0xff]  ;;  %v673_v2 = vld [vmem:[%s1007_s1 + $0x30] sm:$0xff]  ;;  %v672_v4 = vld [vmem:[%s1007_s1 + $0x28] sm:$0xff] }
   0x2   :  { %v690_v1 = vld [vmem:[%s1008_s5 + $0x38] sm:$0xff]  ;;  %157 = vmatpush.bf16.msra.mxu0 %v674_v0  ;;  %738 = vmatpush.bf16.msra.mxu2 %v674_v0  ;;  %v689_v3 = vld [vmem:[%s1008_s5 + $0x30] sm:$0xff]  ;;  %v688_v5 = vld [vmem:[%s1008_s5 + $0x28] sm:$0xff] }
   0x3   :  { %374 = vmatpush.bf16.msra.mxu1 %v690_v1  ;;  %746 = vmatpush.bf16.msra.mxu3 %v690_v1  ;;  %v671_v6 = vld [vmem:[%s1007_s1 + $0x20] sm:$0xff]  ;;  %v670_v8 = vld [vmem:[%s1007_s1 + $0x18] sm:$0xff]  ;;  %v669_v10 = vld [vmem:[%s1007_s1 + $0x10] sm:$0xff] }
   0x4   :  { %v687_v7 = vld [vmem:[%s1008_s5 + $0x20] sm:$0xff]  ;;  %v686_v9 = vld [vmem:[%s1008_s5 + $0x18] sm:$0xff]  ;;  %v685_v11 = vld [vmem:[%s1008_s5 + $0x10] sm:$0xff] }
   0x5   :  { %v668_v12 = vld [vmem:[%s1007_s1 + $0x8] sm:$0xff]  ;;  %v667_v14 = vld [vmem:[%s1007_s1] sm:$0xff]  ;;  %v661_v24 = vld [vmem:[%s1011_s0 + $0x10] sm:$0xff] }
   0x6   :  { %158 = vmatpush.bf16.msra.mxu0 %v673_v2  ;;  %739 = vmatpush.bf16.msra.mxu2 %v673_v2  ;;  %v684_v13 = vld [vmem:[%s1008_s5 + $0x8] sm:$0xff]  ;;  %v683_v15 = vld [vmem:[%s1008_s5] sm:$0xff]  ;;  %v665_v25 = vld [vmem:[%s1011_s0 + $0x30] sm:$0xff] }
   0x7   :  { %375 = vmatpush.bf16.msra.mxu1 %v689_v3  ;;  %747 = vmatpush.bf16.msra.mxu3 %v689_v3  ;;  %v659_v16 = vld [vmem:[%s1011_s0] sm:$0xff]  ;;  %v660_v20 = vld [vmem:[%s1011_s0 + $0x8] sm:$0xff]  ;;  %v677_v26 = vld [vmem:[%s1012_s4 + $0x10] sm:$0xff] }
   0x8   :  { %v663_v17 = vld [vmem:[%s1011_s0 + $0x20] sm:$0xff]  ;;  %v664_v21 = vld [vmem:[%s1011_s0 + $0x28] sm:$0xff]  ;;  %v681_v27 = vld [vmem:[%s1012_s4 + $0x30] sm:$0xff] }
   0x9   :  { %v675_v18 = vld [vmem:[%s1012_s4] sm:$0xff]  ;;  %v676_v22 = vld [vmem:[%s1012_s4 + $0x8] sm:$0xff]  ;;  %v662_v28 = vld [vmem:[%s1011_s0 + $0x18] sm:$0xff] }
   0xa   :  { %159 = vmatpush.bf16.msra.mxu0 %v672_v4  ;;  %740 = vmatpush.bf16.msra.mxu2 %v672_v4  ;;  %v679_v19 = vld [vmem:[%s1012_s4 + $0x20] sm:$0xff]  ;;  %v680_v23 = vld [vmem:[%s1012_s4 + $0x28] sm:$0xff]  ;;  %v666_v29 = vld [vmem:[%s1011_s0 + $0x38] sm:$0xff] }
   0xb   :  { %376 = vmatpush.bf16.msra.mxu1 %v688_v5  ;;  %748 = vmatpush.bf16.msra.mxu3 %v688_v5  ;;  %v678_v30 = vld [vmem:[%s1012_s4 + $0x18] sm:$0xff]  ;;  %v902_v33 = vld [vmem:[%s1009_s2] ss:$0 sm:$0xff] }
   0xc   :  { %v682_v31 = vld [vmem:[%s1012_s4 + $0x38] sm:$0xff]  ;;  %v907_v34 = vld [vmem:[%s1013_s6] ss:$0 sm:$0xff] }
   0xd   :  { %v913_v37 = vld [vmem:[%s1010_s3] ss:$0 sm:$0xff] }
   0xe   :  { %160 = vmatpush.bf16.msra.mxu0 %v671_v6  ;;  %741 = vmatpush.bf16.msra.mxu2 %v671_v6  ;;  %v919_v39 = vld [vmem:[%s1014_s7] ss:$0 sm:$0xff] }
   0xf   :  { %377 = vmatpush.bf16.msra.mxu1 %v687_v7  ;;  %749 = vmatpush.bf16.msra.mxu3 %v687_v7 }
  0x12   :  { %161 = vmatpush.bf16.msra.mxu0 %v670_v8  ;;  %742 = vmatpush.bf16.msra.mxu2 %v670_v8 }
  0x13   :  { %378 = vmatpush.bf16.msra.mxu1 %v686_v9  ;;  %750 = vmatpush.bf16.msra.mxu3 %v686_v9 }
  0x16   :  { %162 = vmatpush.bf16.msra.mxu0 %v669_v10  ;;  %743 = vmatpush.bf16.msra.mxu2 %v669_v10 }
  0x17   :  { %379 = vmatpush.bf16.msra.mxu1 %v685_v11  ;;  %751 = vmatpush.bf16.msra.mxu3 %v685_v11 }
  0x1a   :  { %163 = vmatpush.bf16.msra.mxu0 %v668_v12  ;;  %744 = vmatpush.bf16.msra.mxu2 %v668_v12 }
  0x1b   :  { %380 = vmatpush.bf16.msra.mxu1 %v684_v13  ;;  %752 = vmatpush.bf16.msra.mxu3 %v684_v13 }
  0x1e   :  { %164 = vmatpush.bf16.msra.mxu0 %v667_v14  ;;  %745 = vmatpush.bf16.msra.mxu2 %v667_v14 }
  0x1f   :  { %381 = vmatpush.bf16.msra.mxu1 %v683_v15  ;;  %753 = vmatpush.bf16.msra.mxu3 %v683_v15 }
  0x21   :  { %165 = vmatmul.bf16.vlgmr.msra.gmra.mxu0 %v659_v16  ;;  %185 = vmatmul.bf16.vlgmr.msra.gmra.mxu2 %v663_v17 }
  0x22   :  { %382 = vmatmul.bf16.vlgmr.msra.gmra.mxu1 %v675_v18  ;;  %402 = vmatmul.bf16.vlgmr.msra.gmra.mxu3 %v679_v19 }
  0x31   :  { %170 = vmatmul.bf16.gmra.mxu0 %v660_v20  ;;  %190 = vmatmul.bf16.gmra.mxu2 %v664_v21 }
  0x32   :  { %387 = vmatmul.bf16.gmra.mxu1 %v676_v22  ;;  %407 = vmatmul.bf16.gmra.mxu3 %v680_v23 }
  0x41   :  { %175 = vmatmul.bf16.gmra.mxu0 %v661_v24  ;;  %195 = vmatmul.bf16.gmra.mxu2 %v665_v25 }
  0x42   :  { %392 = vmatmul.bf16.gmra.mxu1 %v677_v26  ;;  %412 = vmatmul.bf16.gmra.mxu3 %v681_v27 }
  0x51   :  { %180 = vmatmul.bf16.gmra.mxu0 %v662_v28  ;;  %200 = vmatmul.bf16.gmra.mxu2 %v666_v29 }
  0x52   :  { %397 = vmatmul.bf16.gmra.mxu1 %v678_v30  ;;  %417 = vmatmul.bf16.gmra.mxu3 %v682_v31 }
  0x9e   :  { %v166_v32 = vpop.f32.mrf.mxu0 }
  0x9f   :  { %v383_v35 = vpop.f32.mrf.mxu1  ;;  %v210_v36 = vmul.f32 %v902_v33, %v166_v32 }
  0xa0   :  { %v427_v38 = vmul.f32 %v907_v34, %v383_v35 }
  0xa1   :  { %v230_v42 = vadd.f32 %v913_v37, %v210_v36 }
  0xa2   :  { %v447_v43 = vadd.f32 %v919_v39, %v427_v38 }
  0xa4   :  { %v186_v40 = vpop.f32.mrf.mxu2  ;;  %v463_v51 = vadd.f32 %v447_v43, %v230_v42 }
  0xa5   :  { %v403_v41 = vpop.f32.mrf.mxu3  ;;  %v218_v47 = vmul.f32 %v902_v33, %v186_v40 }
  0xa6   :  { %v168_v44 = vpop.f32.mrf.mxu0  ;;  %v435_v48 = vmul.f32 %v907_v34, %v403_v41  ;;  %v479_v59 = vmax.f32 %v463_v51, 0.0 }
  0xa7   :  { %v211_v45 = vmul.f32 %v902_v33, %v168_v44  ;;  %v385_v46 = vpop.f32.mrf.mxu1  ;;  %v238_v53 = vadd.f32 %v913_v37, %v218_v47 }
  0xa8   :  { %v428_v49 = vmul.f32 %v907_v34, %v385_v46  ;;  %v455_v54 = vadd.f32 %v919_v39, %v435_v48 }
  0xa9   :  { %v231_v50 = vadd.f32 %v913_v37, %v211_v45 }
  0xaa   :  { %v448_v52 = vadd.f32 %v919_v39, %v428_v49  ;;  %v471_v1 = vadd.f32 %v455_v54, %v238_v53 }
  0xac   :  { %v464_v55 = vadd.f32 %v448_v52, %v231_v50  ;;  %v188_v56 = vpop.f32.mrf.mxu2  ;;  %v487_v7 = vmax.f32 %v471_v1, 0.0 }
  0xad   :  { %v219_v57 = vmul.f32 %v902_v33, %v188_v56  ;;  %v405_v58 = vpop.f32.mrf.mxu3 }
  0xae   :  { %v480_v60 = vmax.f32 %v464_v55, 0.0  ;;  %v436_v61 = vmul.f32 %v907_v34, %v405_v58  ;;  %v171_v62 = vpop.f32.mrf.mxu0 }
  0xaf   :  { %v239_v63 = vadd.f32 %v913_v37, %v219_v57  ;;  %v388_v0 = vpop.f32.mrf.mxu1  ;;  %v212_v5 = vmul.f32 %v902_v33, %v171_v62 }
  0xb0   :  { %v694_v2 = vpack.c.bf16 %v480_v60, %v479_v59  ;;  %v456_v3 = vadd.f32 %v919_v39, %v436_v61  ;;  %v429_v6 = vmul.f32 %v907_v34, %v388_v0 }
  0xb1   :  { %v232_v12 = vadd.f32 %v913_v37, %v212_v5 }
  0xb2   :  { %695 = vst [vmem:[%s1015_s8] sm:$0xff] %v694_v2   ;;  %v472_v4 = vadd.f32 %v456_v3, %v239_v63  ;;  %v449_v13 = vadd.f32 %v919_v39, %v429_v6 }
  0xb4   :  { %v488_v8 = vmax.f32 %v472_v4, 0.0  ;;  %v191_v9 = vpop.f32.mrf.mxu2  ;;  %v465_v21 = vadd.f32 %v449_v13, %v232_v12 }
  0xb5   :  { %v408_v10 = vpop.f32.mrf.mxu3  ;;  %v220_v17 = vmul.f32 %v902_v33, %v191_v9 }
  0xb6   :  { %v714_v11 = vpack.c.bf16 %v488_v8, %v487_v7  ;;  %v173_v14 = vpop.f32.mrf.mxu0  ;;  %v437_v18 = vmul.f32 %v907_v34, %v408_v10  ;;  %v481_v29 = vmax.f32 %v465_v21, 0.0 }
  0xb7   :  { %v213_v15 = vmul.f32 %v902_v33, %v173_v14  ;;  %v390_v16 = vpop.f32.mrf.mxu1  ;;  %v240_v23 = vadd.f32 %v913_v37, %v220_v17 }
  0xb8   :  { %734 = vst [vmem:[%s1015_s8 + $0x20] sm:$0xff] %v714_v11   ;;  %v430_v19 = vmul.f32 %v907_v34, %v390_v16  ;;  %v457_v24 = vadd.f32 %v919_v39, %v437_v18 }
  0xb9   :  { %v233_v20 = vadd.f32 %v913_v37, %v213_v15 }
  0xba   :  { %v450_v22 = vadd.f32 %v919_v39, %v430_v19  ;;  %v473_v38 = vadd.f32 %v457_v24, %v240_v23 }
  0xbc   :  { %v466_v25 = vadd.f32 %v450_v22, %v233_v20  ;;  %v193_v26 = vpop.f32.mrf.mxu2  ;;  %v489_v45 = vmax.f32 %v473_v38, 0.0 }
  0xbd   :  { %v221_v27 = vmul.f32 %v902_v33, %v193_v26  ;;  %v410_v28 = vpop.f32.mrf.mxu3 }
  0xbe   :  { %v482_v30 = vmax.f32 %v466_v25, 0.0  ;;  %v438_v31 = vmul.f32 %v907_v34, %v410_v28  ;;  %v176_v32 = vpop.f32.mrf.mxu0 }
  0xbf   :  { %v241_v35 = vadd.f32 %v913_v37, %v221_v27  ;;  %v393_v36 = vpop.f32.mrf.mxu1  ;;  %v214_v43 = vmul.f32 %v902_v33, %v176_v32 }
  0xc0   :  { %v699_v40 = vpack.c.bf16 %v482_v30, %v481_v29  ;;  %v458_v41 = vadd.f32 %v919_v39, %v438_v31  ;;  %v431_v44 = vmul.f32 %v907_v34, %v393_v36 }
  0xc1   :  { %v234_v50 = vadd.f32 %v913_v37, %v214_v43 }
  0xc2   :  { %731 = vst [vmem:[%s1015_s8 + $0x8] sm:$0xff] %v699_v40   ;;  %v474_v42 = vadd.f32 %v458_v41, %v241_v35  ;;  %v451_v51 = vadd.f32 %v919_v39, %v431_v44 }
  0xc4   :  { %v490_v46 = vmax.f32 %v474_v42, 0.0  ;;  %v196_v47 = vpop.f32.mrf.mxu2  ;;  %v467_v59 = vadd.f32 %v451_v51, %v234_v50 }
  0xc5   :  { %v413_v48 = vpop.f32.mrf.mxu3  ;;  %v222_v55 = vmul.f32 %v902_v33, %v196_v47 }
  0xc6   :  { %v719_v49 = vpack.c.bf16 %v490_v46, %v489_v45  ;;  %v178_v52 = vpop.f32.mrf.mxu0  ;;  %v439_v56 = vmul.f32 %v907_v34, %v413_v48  ;;  %v483_v3 = vmax.f32 %v467_v59, 0.0 }
  0xc7   :  { %v215_v53 = vmul.f32 %v902_v33, %v178_v52  ;;  %v395_v54 = vpop.f32.mrf.mxu1  ;;  %v242_v61 = vadd.f32 %v913_v37, %v222_v55 }
  0xc8   :  { %735 = vst [vmem:[%s1015_s8 + $0x28] sm:$0xff] %v719_v49   ;;  %v432_v57 = vmul.f32 %v907_v34, %v395_v54  ;;  %v459_v62 = vadd.f32 %v919_v39, %v439_v56 }
  0xc9   :  { %v235_v58 = vadd.f32 %v913_v37, %v215_v53 }
  0xca   :  { %v452_v60 = vadd.f32 %v919_v39, %v432_v57  ;;  %v475_v9 = vadd.f32 %v459_v62, %v242_v61 }
  0xcc   :  { %v468_v63 = vadd.f32 %v452_v60, %v235_v58  ;;  %v198_v0 = vpop.f32.mrf.mxu2  ;;  %v491_v15 = vmax.f32 %v475_v9, 0.0 }
  0xcd   :  { %v223_v1 = vmul.f32 %v902_v33, %v198_v0  ;;  %v415_v2 = vpop.f32.mrf.mxu3 }
  0xce   :  { %v484_v4 = vmax.f32 %v468_v63, 0.0  ;;  %v440_v5 = vmul.f32 %v907_v34, %v415_v2  ;;  %v181_v6 = vpop.f32.mrf.mxu0 }
  0xcf   :  { %v243_v7 = vadd.f32 %v913_v37, %v223_v1  ;;  %v398_v8 = vpop.f32.mrf.mxu1  ;;  %v216_v13 = vmul.f32 %v902_v33, %v181_v6 }
  0xd0   :  { %v704_v10 = vpack.c.bf16 %v484_v4, %v483_v3  ;;  %v460_v11 = vadd.f32 %v919_v39, %v440_v5  ;;  %v433_v14 = vmul.f32 %v907_v34, %v398_v8 }
  0xd1   :  { %v236_v20 = vadd.f32 %v913_v37, %v216_v13 }
  0xd2   :  { %732 = vst [vmem:[%s1015_s8 + $0x10] sm:$0xff] %v704_v10   ;;  %v476_v12 = vadd.f32 %v460_v11, %v243_v7  ;;  %v453_v21 = vadd.f32 %v919_v39, %v433_v14 }
  0xd4   :  { %v492_v16 = vmax.f32 %v476_v12, 0.0  ;;  %v201_v17 = vpop.f32.mrf.mxu2  ;;  %v469_v29 = vadd.f32 %v453_v21, %v236_v20 }
  0xd5   :  { %v418_v18 = vpop.f32.mrf.mxu3  ;;  %v224_v25 = vmul.f32 %v902_v33, %v201_v17 }
  0xd6   :  { %v724_v19 = vpack.c.bf16 %v492_v16, %v491_v15  ;;  %v183_v22 = vpop.f32.mrf.mxu0  ;;  %v441_v26 = vmul.f32 %v907_v34, %v418_v18  ;;  %v485_v41 = vmax.f32 %v469_v29, 0.0 }
  0xd7   :  { %v217_v23 = vmul.f32 %v902_v33, %v183_v22  ;;  %v400_v24 = vpop.f32.mrf.mxu1  ;;  %v244_v31 = vadd.f32 %v913_v37, %v224_v25 }
  0xd8   :  { %736 = vst [vmem:[%s1015_s8 + $0x30] sm:$0xff] %v724_v19   ;;  %v434_v27 = vmul.f32 %v907_v34, %v400_v24  ;;  %v461_v32 = vadd.f32 %v919_v39, %v441_v26 }
  0xd9   :  { %v237_v28 = vadd.f32 %v913_v37, %v217_v23 }
  0xda   :  { %v454_v30 = vadd.f32 %v919_v39, %v434_v27  ;;  %v477_v45 = vadd.f32 %v461_v32, %v244_v31 }
  0xdc   :  { %v470_v35 = vadd.f32 %v454_v30, %v237_v28  ;;  %v203_v36 = vpop.f32.mrf.mxu2  ;;  %v493_v49 = vmax.f32 %v477_v45, 0.0 }
  0xdd   :  { %v225_v38 = vmul.f32 %v902_v33, %v203_v36  ;;  %v420_v40 = vpop.f32.mrf.mxu3 }
  0xde   :  { %v486_v42 = vmax.f32 %v470_v35, 0.0  ;;  %v442_v43 = vmul.f32 %v907_v34, %v420_v40 }
  0xdf   :  { %v245_v44 = vadd.f32 %v913_v37, %v225_v38 }
  0xe0   :  { %v709_v46 = vpack.c.bf16 %v486_v42, %v485_v41  ;;  %v462_v47 = vadd.f32 %v919_v39, %v442_v43 }
  0xe2   :  { %733 = vst [vmem:[%s1015_s8 + $0x18] sm:$0xff] %v709_v46   ;;  %v478_v48 = vadd.f32 %v462_v47, %v245_v44 }
  0xe4   :  { %v494_v50 = vmax.f32 %v478_v48, 0.0 }
  0xe6   :  { %v729_v51 = vpack.c.bf16 %v494_v50, %v493_v49 }
  0xe8   :  { %737 = vst [vmem:[%s1015_s8 + $0x38] sm:$0xff] %v729_v51  }

</bundles_post_ra>
